<compile_context>
chip_gen: v7x
topology: tpu7x:2x2x1
jax: 0.10.0
libtpu: 0.0.40
codegen_flags: <defaults>
</compile_context>

<pallas_src>
import jax
import jax.numpy as jnp
from jax.experimental import pallas as pl
from jax.experimental.pallas import tpu as pltpu

POOL = 32            # MaxPool2d(kernel_size=32)
_VPU_MAX_FAN = 512   # use the NCHW/VPU path when Cin * Cout <= this
_MXU_MAX_BH = 8      # cap on statically unrolled window-rows per grid step (MXU path)


# --------------------------------------------------------------------------------------
# Kernels
# --------------------------------------------------------------------------------------
def _vpu_kernel(x_ref, w_ref, shift_ref, o_ref):
    # x_ref:     (1, Cin, BH*POOL, W)   NCHW input strip (VMEM)
    # w_ref:     (Cout, Cin)            BN-folded conv weight, f32 (SMEM scalars)
    # shift_ref: (Cout,)                post-pool shift, f32 (SMEM scalars)
    # o_ref:     (1, BH, Cout, Wout)
    _, Cin, bh_pool, W = x_ref.shape
    _, BH, Cout, Wout = o_ref.shape

    for co in range(Cout):                              # static unroll (small on this path)
        acc = x_ref[0, 0].astype(jnp.float32) * w_ref[co, 0]
        for ci in range(1, Cin):
            acc = acc + x_ref[0, ci].astype(jnp.float32) * w_ref[co, ci]
        # Max-pool: reduce the 32 in-window rows first (aligned sublane groups, free
        # reshape), then the 32 in-window columns on the small (BH, W) remainder.
        acc = jnp.max(acc.reshape(BH, POOL, W), axis=1)        # (BH, W)
        acc = jnp.max(acc.reshape(BH, Wout, POOL), axis=2)     # (BH, Wout)
        out = jnp.maximum(acc + shift_ref[co], 0.0)            # shift + ReLU, post-pool
        o_ref[0, :, co, :] = out.astype(o_ref.dtype)           # tiny per-channel store


def _mxu_kernel(x_ref, w_ref, shift_ref, o_ref):
    # x_ref:     (1, BH*POOL, W, Cin)   NHWC input strip
    # w_ref:     (Cin, Cout)            BN-folded conv weight (input dtype)
    # shift_ref: (1, Cout)              post-pool shift, f32
    # o_ref:     (1, BH, Wout, Cout)
    _, bh_pool, W, Cin = x_ref.shape
    _, BH, Wout, Cout = o_ref.shape
    shift = shift_ref[...]                              # (1, Cout)

    outs = []
    for bh in range(BH):                                # static unroll (<= _MXU_MAX_BH)
        # Free-view reshape: W % 8 == 0 is guaranteed (W % 32 == 0).
        xb = x_ref[0, bh * POOL:(bh + 1) * POOL].reshape(POOL * W, Cin)
        yb = jnp.dot(xb, w_ref[...], preferred_element_type=jnp.float32)   # (POOL*W, Cout)
        yb = yb.reshape(POOL, Wout, POOL, Cout)         # rows index = h*W + wo*POOL + j
        pooled = jnp.max(jnp.max(yb, axis=2), axis=0)   # (Wout, Cout)
        outs.append(jnp.maximum(pooled + shift, 0.0))
    # One packed, lane-dense store per grid step (instead of BH masked row stores).
    o_ref[0] = jnp.stack(outs, axis=0).astype(o_ref.dtype)


# --------------------------------------------------------------------------------------
# Sizing helpers (generation-aware VMEM budgeting)
# --------------------------------------------------------------------------------------
def _round_up(x, m):
    return -(-x // m) * m


def _vmem_limit_bytes():
    cap = None
    try:
        cap = getattr(pltpu.get_tpu_info(), "vmem_capacity_bytes", None)
    except Exception:
        cap = None
    if not cap:
        cap = 64 << 20                    # conservative fallback (v7x per-core VMEM)
    return int(cap) * 3 // 4              # headroom for compiler-internal scratch


def _pick_bh(N, Hout, per_bh_bytes, fixed_bytes, budget_bytes, cap=None):
    """Largest divisor of Hout whose estimated VMEM working set fits the budget."""
    avail = max(budget_bytes - fixed_bytes, per_bh_bytes)
    bh = max(1, int(avail // per_bh_bytes))
    bh = min(bh, Hout)
    if cap is not None:
        bh = min(bh, cap)
    if N == 1 and Hout > 1:               # keep >= 2 grid steps for v7x megacore
        bh = min(bh, max(1, Hout // 2))
    while Hout % bh:
        bh -= 1
    return bh


# --------------------------------------------------------------------------------------
# Wrapper
# --------------------------------------------------------------------------------------
def block_type4_forward(x_nchw, conv_w, conv_b, gamma, beta,
                        running_mean, running_var, eps=1e-5):
    """BlockType4 forward: (N, Cin, H, W) -> (N, Cout, H//32, W//32)."""
    N, Cin, H, W = x_nchw.shape
    Cout = conv_w.shape[0]
    assert H % POOL == 0 and W % POOL == 0, "spatial dims must be multiples of 32"
    Hout, Wout = H // POOL, W // POOL
    dtype = x_nchw.dtype
    itemsize = jnp.dtype(dtype).itemsize

    # Fold eval-mode BN scale into the 1x1 conv weight; keep shift for the post-pool epilogue.
    inv_std = 1.0 / jnp.sqrt(running_var.astype(jnp.float32) + eps)
    scale = gamma.astype(jnp.float32) * inv_std                            # (Cout,)
    w2d = conv_w.reshape(Cout, Cin).astype(jnp.float32) * scale[:, None]   # (Cout, Cin) f32
    shift = ((conv_b.astype(jnp.float32) - running_mean.astype(jnp.float32)) * scale
             + beta.astype(jnp.float32))                                   # (Cout,) f32

    vmem_limit = _vmem_limit_bytes()
    budget = vmem_limit // 3              # per-step working-set target

    if Cin * Cout <= _VPU_MAX_FAN:
        # -------- NCHW-native VPU path: no host transpose of x. --------
        Wpad = _round_up(W, 128)
        per_bh = (2 * Cin * POOL * Wpad * itemsize    # double-buffered x rows
                  + 2 * POOL * Wpad * 4)              # f32 accumulator plane (+headroom)
        BH = _pick_bh(N, Hout, per_bh, 0, budget)
        grid = (N, Hout // BH)

        out = pl.pallas_call(
            _vpu_kernel,
            out_shape=jax.ShapeDtypeStruct((N, Hout, Cout, Wout), dtype),
            grid_spec=pltpu.PrefetchScalarGridSpec(
                num_scalar_prefetch=0,
                grid=grid,
                in_specs=[
                    pl.BlockSpec((1, Cin, BH * POOL, W), lambda n, hb: (n, 0, hb, 0)),
                    pl.BlockSpec(memory_space=pltpu.MemorySpace.SMEM),   # weights (scalars)
                    pl.BlockSpec(memory_space=pltpu.MemorySpace.SMEM),   # shift   (scalars)
                ],
                out_specs=pl.BlockSpec((1, BH, Cout, Wout), lambda n, hb: (n, hb, 0, 0)),
            ),
            compiler_params=pltpu.CompilerParams(
                dimension_semantics=("parallel", "parallel"),
                vmem_limit_bytes=vmem_limit),
        )(x_nchw, w2d, shift)
        # (N, Hout, Cout, Wout) -> (N, Cout, Hout, Wout); output volume is tiny.
        return jnp.transpose(out, (0, 2, 1, 3))

    # -------- Channels-last MXU path for large Cin*Cout. --------
    # TODO(synk): an NCHW-native MXU formulation would also drop this host transpose.
    x = jnp.transpose(x_nchw, (0, 2, 3, 1))              # (N, H, W, Cin)
    w_mx = w2d.T.astype(dtype)                           # (Cin, Cout)
    shift_mx = shift[None, :]                            # (1, Cout) f32

    Cin_pad, Cout_pad = _round_up(Cin, 128), _round_up(Cout, 128)
    # Weight/shift have constant index maps but are still double-buffered by the
    # pipeline; account for them instead of risking Buffered(1).
    fixed = 2 * Cin_pad * Cout_pad * itemsize + 2 * POOL * W * Cout_pad * 4
    per_bh = 2 * POOL * W * Cin_pad * itemsize
    BH = _pick_bh(N, Hout, per_bh, fixed, budget, cap=_MXU_MAX_BH)
    grid = (N, Hout // BH)

    out = pl.pallas_call(
        _mxu_kernel,
        out_shape=jax.ShapeDtypeStruct((N, Hout, Wout, Cout), dtype),
        grid_spec=pltpu.PrefetchScalarGridSpec(
            num_scalar_prefetch=0,
            grid=grid,
            in_specs=[
                pl.BlockSpec((1, BH * POOL, W, Cin), lambda n, hb: (n, hb, 0, 0)),
                pl.BlockSpec((Cin, Cout), lambda n, hb: (0, 0)),
                pl.BlockSpec((1, Cout), lambda n, hb: (0, 0)),
            ],
            out_specs=pl.BlockSpec((1, BH, Wout, Cout), lambda n, hb: (n, hb, 0, 0)),
        ),
        compiler_params=pltpu.CompilerParams(
            dimension_semantics=("parallel", "parallel"),
            vmem_limit_bytes=vmem_limit),
    )(x, w_mx, shift_mx)
    return jnp.transpose(out, (0, 3, 1, 2))              # (N, Cout, Hout, Wout)


# --------------------------------------------------------------------------------------
# Reference + self-test
# --------------------------------------------------------------------------------------
def _reference(x_nchw, conv_w, conv_b, gamma, beta, mean, var, eps=1e-5):
    N, Cin, H, W = x_nchw.shape
    Cout = conv_w.shape[0]
    x = jnp.transpose(x_nchw, (0, 2, 3, 1))
    y = jnp.einsum("nhwc,oc->nhwo", x, conv_w.reshape(Cout, Cin)) + conv_b
    y = (y - mean) / jnp.sqrt(var + eps) * gamma + beta
    y = jnp.maximum(y, 0.0)
    Hout, Wout = H // POOL, W // POOL
    y = y.reshape(N, Hout, POOL, Wout, POOL, Cout)
    y = jnp.max(y, axis=(2, 4))
    return jnp.transpose(y, (0, 3, 1, 2))


if __name__ == "__main__":
    key = jax.random.PRNGKey(0)

    def make_params(k, Cin, Cout):
        k_w, k_b, k_g, k_be, k_m, k_v = jax.random.split(k, 6)
        conv_w = jax.random.normal(k_w, (Cout, Cin, 1, 1), jnp.float32) * 0.2
        conv_b = jax.random.normal(k_b, (Cout,), jnp.float32) * 0.1
        gamma = 1.0 + 0.1 * jax.random.normal(k_g, (Cout,), jnp.float32)
        beta = 0.1 * jax.random.normal(k_be, (Cout,), jnp.float32)
        mean = 0.1 * jax.random.normal(k_m, (Cout,), jnp.float32)
        var = jax.random.uniform(k_v, (Cout,), minval=0.5, maxval=1.5, dtype=jnp.float32)
        return conv_w, conv_b, gamma, beta, mean, var

    k1, k2, kx1, kx2 = jax.random.split(key, 4)

    # Case 1: small channels -> NCHW-native VPU path (module's typical regime).
    N, Cin, Cout, H, W = 2, 4, 8, 64, 64
    x = jax.random.normal(kx1, (N, Cin, H, W), jnp.float32)
    params = make_params(k1, Cin, Cout)
    out = jax.block_until_ready(block_type4_forward(x, *params))
    ref = _reference(x, *params)
    assert out.shape == (N, Cout, H // POOL, W // POOL), out.shape
    assert jnp.allclose(out, ref, atol=1e-4, rtol=1e-4), "VPU-path mismatch vs reference"

    # Case 2: larger channels -> channels-last MXU path.
    N2, Cin2, Cout2, H2, W2 = 2, 64, 128, 32, 32
    x2 = jax.random.normal(kx2, (N2, Cin2, H2, W2), jnp.float32)
    params2 = make_params(k2, Cin2, Cout2)
    out2 = jax.block_until_ready(block_type4_forward(x2, *params2))
    ref2 = _reference(x2, *params2)
    assert out2.shape == (N2, Cout2, 1, 1), out2.shape
    assert jnp.allclose(out2, ref2, atol=5e-3, rtol=5e-3), "MXU-path mismatch vs reference"

    print("KERNEL_OK")
</pallas_src>

<mosaic_0001>
module attributes {stable_mosaic.version = 11 : i64} {
  func.func @_vpu_kernel(%arg0: i32, %arg1: i32, %arg2: memref<1x4x64x64xf32, #tpu.memory_space<vmem>>, %arg3: memref<8x4xf32, #tpu.memory_space<smem>>, %arg4: memref<8xf32, #tpu.memory_space<smem>>, %arg5: memref<1x2x8x2xf32, #tpu.memory_space<vmem>>) attributes {dimension_semantics = [#tpu.dimension_semantics<parallel>, #tpu.dimension_semantics<parallel>], iteration_bounds = array<i64: 2, 1>, scalar_prefetch = 0 : i64, scratch_operands = 0 : i64, tpu.core_type = #tpu.core_type<tc>, window_params = [{transform_indices = @transform_0, window_bounds = array<i64: 1, 4, 64, 64>}, {transform_indices = @transform_1, window_bounds = array<i64: 8, 4>}, {transform_indices = @transform_2, window_bounds = array<i64: 8>}, {transform_indices = @transform_3, window_bounds = array<i64: 1, 2, 8, 2>}]} {
    %c0 = arith.constant 0 : index
    %c0_0 = arith.constant 0 : index
    %c0_1 = arith.constant 0 : index
    %c0_2 = arith.constant 0 : index
    %0 = vector.load %arg2[%c0, %c0_0, %c0_1, %c0_2] : memref<1x4x64x64xf32, #tpu.memory_space<vmem>>, vector<1x1x64x64xf32>
    %1 = vector.shape_cast %0 : vector<1x1x64x64xf32> to vector<64x64xf32>
    %c0_3 = arith.constant 0 : index
    %c0_4 = arith.constant 0 : index
    %2 = memref.load %arg3[%c0_3, %c0_4] : memref<8x4xf32, #tpu.memory_space<smem>>
    %3 = vector.broadcast %2 : f32 to vector<64x64xf32>
    %4 = arith.mulf %1, %3 : vector<64x64xf32>
    %c0_5 = arith.constant 0 : index
    %c1 = arith.constant 1 : index
    %c0_6 = arith.constant 0 : index
    %c0_7 = arith.constant 0 : index
    %5 = vector.load %arg2[%c0_5, %c1, %c0_6, %c0_7] : memref<1x4x64x64xf32, #tpu.memory_space<vmem>>, vector<1x1x64x64xf32>
    %6 = vector.shape_cast %5 : vector<1x1x64x64xf32> to vector<64x64xf32>
    %c0_8 = arith.constant 0 : index
    %c1_9 = arith.constant 1 : index
    %7 = memref.load %arg3[%c0_8, %c1_9] : memref<8x4xf32, #tpu.memory_space<smem>>
    %8 = vector.broadcast %7 : f32 to vector<64x64xf32>
    %9 = arith.mulf %6, %8 : vector<64x64xf32>
    %10 = arith.addf %4, %9 : vector<64x64xf32>
    %c0_10 = arith.constant 0 : index
    %c2 = arith.constant 2 : index
    %c0_11 = arith.constant 0 : index
    %c0_12 = arith.constant 0 : index
    %11 = vector.load %arg2[%c0_10, %c2, %c0_11, %c0_12] : memref<1x4x64x64xf32, #tpu.memory_space<vmem>>, vector<1x1x64x64xf32>
    %12 = vector.shape_cast %11 : vector<1x1x64x64xf32> to vector<64x64xf32>
    %c0_13 = arith.constant 0 : index
    %c2_14 = arith.constant 2 : index
    %13 = memref.load %arg3[%c0_13, %c2_14] : memref<8x4xf32, #tpu.memory_space<smem>>
    %14 = vector.broadcast %13 : f32 to vector<64x64xf32>
    %15 = arith.mulf %12, %14 : vector<64x64xf32>
    %16 = arith.addf %10, %15 : vector<64x64xf32>
    %c0_15 = arith.constant 0 : index
    %c3 = arith.constant 3 : index
    %c0_16 = arith.constant 0 : index
    %c0_17 = arith.constant 0 : index
    %17 = vector.load %arg2[%c0_15, %c3, %c0_16, %c0_17] : memref<1x4x64x64xf32, #tpu.memory_space<vmem>>, vector<1x1x64x64xf32>
    %18 = vector.shape_cast %17 : vector<1x1x64x64xf32> to vector<64x64xf32>
    %c0_18 = arith.constant 0 : index
    %c3_19 = arith.constant 3 : index
    %19 = memref.load %arg3[%c0_18, %c3_19] : memref<8x4xf32, #tpu.memory_space<smem>>
    %20 = vector.broadcast %19 : f32 to vector<64x64xf32>
    %21 = arith.mulf %18, %20 : vector<64x64xf32>
    %22 = arith.addf %16, %21 : vector<64x64xf32>
    %23 = vector.shape_cast %22 : vector<64x64xf32> to vector<2x32x64xf32>
    %cst = arith.constant dense<0xFF800000> : vector<2x64xf32>
    %24 = vector.multi_reduction <maximumf>, %23, %cst [1] : vector<2x32x64xf32> to vector<2x64xf32>
    %25 = vector.shape_cast %24 : vector<2x64xf32> to vector<2x2x32xf32>
    %cst_20 = arith.constant dense<0xFF800000> : vector<2x2xf32>
    %26 = vector.multi_reduction <maximumf>, %25, %cst_20 [2] : vector<2x2x32xf32> to vector<2x2xf32>
    %c0_21 = arith.constant 0 : index
    %27 = memref.load %arg4[%c0_21] : memref<8xf32, #tpu.memory_space<smem>>
    %28 = vector.broadcast %27 : f32 to vector<2x2xf32>
    %29 = arith.addf %26, %28 : vector<2x2xf32>
    %cst_22 = arith.constant 0.000000e+00 : f32
    %30 = vector.broadcast %cst_22 : f32 to vector<2x2xf32>
    %31 = arith.maximumf %29, %30 : vector<2x2xf32>
    %c0_23 = arith.constant 0 : index
    %c0_24 = arith.constant 0 : index
    %c0_25 = arith.constant 0 : index
    %c0_26 = arith.constant 0 : index
    %32 = vector.load %arg5[%c0_23, %c0_24, %c0_25, %c0_26] : memref<1x2x8x2xf32, #tpu.memory_space<vmem>>, vector<1x2x1x2xf32>
    %33 = vector.shape_cast %32 : vector<1x2x1x2xf32> to vector<2x2xf32>
    %34 = vector.shape_cast %31 : vector<2x2xf32> to vector<1x2x1x2xf32>
    tpu.vector_store %arg5[%c0_23, %c0_24, %c0_25, %c0_26], %34 {strides = array<i32>} : memref<1x2x8x2xf32, #tpu.memory_space<vmem>>, vector<1x2x1x2xf32>,
    %c0_27 = arith.constant 0 : index
    %c0_28 = arith.constant 0 : index
    %c0_29 = arith.constant 0 : index
    %c0_30 = arith.constant 0 : index
    %35 = vector.load %arg2[%c0_27, %c0_28, %c0_29, %c0_30] : memref<1x4x64x64xf32, #tpu.memory_space<vmem>>, vector<1x1x64x64xf32>
    %36 = vector.shape_cast %35 : vector<1x1x64x64xf32> to vector<64x64xf32>
    %c1_31 = arith.constant 1 : index
    %c0_32 = arith.constant 0 : index
    %37 = memref.load %arg3[%c1_31, %c0_32] : memref<8x4xf32, #tpu.memory_space<smem>>
    %38 = vector.broadcast %37 : f32 to vector<64x64xf32>
    %39 = arith.mulf %36, %38 : vector<64x64xf32>
    %c0_33 = arith.constant 0 : index
    %c1_34 = arith.constant 1 : index
    %c0_35 = arith.constant 0 : index
    %c0_36 = arith.constant 0 : index
    %40 = vector.load %arg2[%c0_33, %c1_34, %c0_35, %c0_36] : memref<1x4x64x64xf32, #tpu.memory_space<vmem>>, vector<1x1x64x64xf32>
    %41 = vector.shape_cast %40 : vector<1x1x64x64xf32> to vector<64x64xf32>
    %c1_37 = arith.constant 1 : index
    %c1_38 = arith.constant 1 : index
    %42 = memref.load %arg3[%c1_37, %c1_38] : memref<8x4xf32, #tpu.memory_space<smem>>
    %43 = vector.broadcast %42 : f32 to vector<64x64xf32>
    %44 = arith.mulf %41, %43 : vector<64x64xf32>
    %45 = arith.addf %39, %44 : vector<64x64xf32>
    %c0_39 = arith.constant 0 : index
    %c2_40 = arith.constant 2 : index
    %c0_41 = arith.constant 0 : index
    %c0_42 = arith.constant 0 : index
    %46 = vector.load %arg2[%c0_39, %c2_40, %c0_41, %c0_42] : memref<1x4x64x64xf32, #tpu.memory_space<vmem>>, vector<1x1x64x64xf32>
    %47 = vector.shape_cast %46 : vector<1x1x64x64xf32> to vector<64x64xf32>
    %c1_43 = arith.constant 1 : index
    %c2_44 = arith.constant 2 : index
    %48 = memref.load %arg3[%c1_43, %c2_44] : memref<8x4xf32, #tpu.memory_space<smem>>
    %49 = vector.broadcast %48 : f32 to vector<64x64xf32>
    %50 = arith.mulf %47, %49 : vector<64x64xf32>
    %51 = arith.addf %45, %50 : vector<64x64xf32>
    %c0_45 = arith.constant 0 : index
    %c3_46 = arith.constant 3 : index
    %c0_47 = arith.constant 0 : index
    %c0_48 = arith.constant 0 : index
    %52 = vector.load %arg2[%c0_45, %c3_46, %c0_47, %c0_48] : memref<1x4x64x64xf32, #tpu.memory_space<vmem>>, vector<1x1x64x64xf32>
    %53 = vector.shape_cast %52 : vector<1x1x64x64xf32> to vector<64x64xf32>
    %c1_49 = arith.constant 1 : index
    %c3_50 = arith.constant 3 : index
    %54 = memref.load %arg3[%c1_49, %c3_50] : memref<8x4xf32, #tpu.memory_space<smem>>
    %55 = vector.broadcast %54 : f32 to vector<64x64xf32>
    %56 = arith.mulf %53, %55 : vector<64x64xf32>
    %57 = arith.addf %51, %56 : vector<64x64xf32>
    %58 = vector.shape_cast %57 : vector<64x64xf32> to vector<2x32x64xf32>
    %cst_51 = arith.constant dense<0xFF800000> : vector<2x64xf32>
    %59 = vector.multi_reduction <maximumf>, %58, %cst_51 [1] : vector<2x32x64xf32> to vector<2x64xf32>
    %60 = vector.shape_cast %59 : vector<2x64xf32> to vector<2x2x32xf32>
    %cst_52 = arith.constant dense<0xFF800000> : vector<2x2xf32>
    %61 = vector.multi_reduction <maximumf>, %60, %cst_52 [2] : vector<2x2x32xf32> to vector<2x2xf32>
    %c1_53 = arith.constant 1 : index
    %62 = memref.load %arg4[%c1_53] : memref<8xf32, #tpu.memory_space<smem>>
    %63 = vector.broadcast %62 : f32 to vector<2x2xf32>
    %64 = arith.addf %61, %63 : vector<2x2xf32>
    %cst_54 = arith.constant 0.000000e+00 : f32
    %65 = vector.broadcast %cst_54 : f32 to vector<2x2xf32>
    %66 = arith.maximumf %64, %65 : vector<2x2xf32>
    %c0_55 = arith.constant 0 : index
    %c0_56 = arith.constant 0 : index
    %c1_57 = arith.constant 1 : index
    %c0_58 = arith.constant 0 : index
    %67 = vector.load %arg5[%c0_55, %c0_56, %c1_57, %c0_58] : memref<1x2x8x2xf32, #tpu.memory_space<vmem>>, vector<1x2x1x2xf32>
    %68 = vector.shape_cast %67 : vector<1x2x1x2xf32> to vector<2x2xf32>
    %69 = vector.shape_cast %66 : vector<2x2xf32> to vector<1x2x1x2xf32>
    tpu.vector_store %arg5[%c0_55, %c0_56, %c1_57, %c0_58], %69 {strides = array<i32>} : memref<1x2x8x2xf32, #tpu.memory_space<vmem>>, vector<1x2x1x2xf32>,
    %c0_59 = arith.constant 0 : index
    %c0_60 = arith.constant 0 : index
    %c0_61 = arith.constant 0 : index
    %c0_62 = arith.constant 0 : index
    %70 = vector.load %arg2[%c0_59, %c0_60, %c0_61, %c0_62] : memref<1x4x64x64xf32, #tpu.memory_space<vmem>>, vector<1x1x64x64xf32>
    %71 = vector.shape_cast %70 : vector<1x1x64x64xf32> to vector<64x64xf32>
    %c2_63 = arith.constant 2 : index
    %c0_64 = arith.constant 0 : index
    %72 = memref.load %arg3[%c2_63, %c0_64] : memref<8x4xf32, #tpu.memory_space<smem>>
    %73 = vector.broadcast %72 : f32 to vector<64x64xf32>
    %74 = arith.mulf %71, %73 : vector<64x64xf32>
    %c0_65 = arith.constant 0 : index
    %c1_66 = arith.constant 1 : index
    %c0_67 = arith.constant 0 : index
    %c0_68 = arith.constant 0 : index
    %75 = vector.load %arg2[%c0_65, %c1_66, %c0_67, %c0_68] : memref<1x4x64x64xf32, #tpu.memory_space<vmem>>, vector<1x1x64x64xf32>
    %76 = vector.shape_cast %75 : vector<1x1x64x64xf32> to vector<64x64xf32>
    %c2_69 = arith.constant 2 : index
    %c1_70 = arith.constant 1 : index
    %77 = memref.load %arg3[%c2_69, %c1_70] : memref<8x4xf32, #tpu.memory_space<smem>>
    %78 = vector.broadcast %77 : f32 to vector<64x64xf32>
    %79 = arith.mulf %76, %78 : vector<64x64xf32>
    %80 = arith.addf %74, %79 : vector<64x64xf32>
    %c0_71 = arith.constant 0 : index
    %c2_72 = arith.constant 2 : index
    %c0_73 = arith.constant 0 : index
    %c0_74 = arith.constant 0 : index
    %81 = vector.load %arg2[%c0_71, %c2_72, %c0_73, %c0_74] : memref<1x4x64x64xf32, #tpu.memory_space<vmem>>, vector<1x1x64x64xf32>
    %82 = vector.shape_cast %81 : vector<1x1x64x64xf32> to vector<64x64xf32>
    %c2_75 = arith.constant 2 : index
    %c2_76 = arith.constant 2 : index
    %83 = memref.load %arg3[%c2_75, %c2_76] : memref<8x4xf32, #tpu.memory_space<smem>>
    %84 = vector.broadcast %83 : f32 to vector<64x64xf32>
    %85 = arith.mulf %82, %84 : vector<64x64xf32>
    %86 = arith.addf %80, %85 : vector<64x64xf32>
    %c0_77 = arith.constant 0 : index
    %c3_78 = arith.constant 3 : index
    %c0_79 = arith.constant 0 : index
    %c0_80 = arith.constant 0 : index
    %87 = vector.load %arg2[%c0_77, %c3_78, %c0_79, %c0_80] : memref<1x4x64x64xf32, #tpu.memory_space<vmem>>, vector<1x1x64x64xf32>
    %88 = vector.shape_cast %87 : vector<1x1x64x64xf32> to vector<64x64xf32>
    %c2_81 = arith.constant 2 : index
    %c3_82 = arith.constant 3 : index
    %89 = memref.load %arg3[%c2_81, %c3_82] : memref<8x4xf32, #tpu.memory_space<smem>>
    %90 = vector.broadcast %89 : f32 to vector<64x64xf32>
    %91 = arith.mulf %88, %90 : vector<64x64xf32>
    %92 = arith.addf %86, %91 : vector<64x64xf32>
    %93 = vector.shape_cast %92 : vector<64x64xf32> to vector<2x32x64xf32>
    %cst_83 = arith.constant dense<0xFF800000> : vector<2x64xf32>
    %94 = vector.multi_reduction <maximumf>, %93, %cst_83 [1] : vector<2x32x64xf32> to vector<2x64xf32>
    %95 = vector.shape_cast %94 : vector<2x64xf32> to vector<2x2x32xf32>
    %cst_84 = arith.constant dense<0xFF800000> : vector<2x2xf32>
    %96 = vector.multi_reduction <maximumf>, %95, %cst_84 [2] : vector<2x2x32xf32> to vector<2x2xf32>
    %c2_85 = arith.constant 2 : index
    %97 = memref.load %arg4[%c2_85] : memref<8xf32, #tpu.memory_space<smem>>
    %98 = vector.broadcast %97 : f32 to vector<2x2xf32>
    %99 = arith.addf %96, %98 : vector<2x2xf32>
    %cst_86 = arith.constant 0.000000e+00 : f32
    %100 = vector.broadcast %cst_86 : f32 to vector<2x2xf32>
    %101 = arith.maximumf %99, %100 : vector<2x2xf32>
    %c0_87 = arith.constant 0 : index
    %c0_88 = arith.constant 0 : index
    %c2_89 = arith.constant 2 : index
    %c0_90 = arith.constant 0 : index
    %102 = vector.load %arg5[%c0_87, %c0_88, %c2_89, %c0_90] : memref<1x2x8x2xf32, #tpu.memory_space<vmem>>, vector<1x2x1x2xf32>
    %103 = vector.shape_cast %102 : vector<1x2x1x2xf32> to vector<2x2xf32>
    %104 = vector.shape_cast %101 : vector<2x2xf32> to vector<1x2x1x2xf32>
    tpu.vector_store %arg5[%c0_87, %c0_88, %c2_89, %c0_90], %104 {strides = array<i32>} : memref<1x2x8x2xf32, #tpu.memory_space<vmem>>, vector<1x2x1x2xf32>,
    %c0_91 = arith.constant 0 : index
    %c0_92 = arith.constant 0 : index
    %c0_93 = arith.constant 0 : index
    %c0_94 = arith.constant 0 : index
    %105 = vector.load %arg2[%c0_91, %c0_92, %c0_93, %c0_94] : memref<1x4x64x64xf32, #tpu.memory_space<vmem>>, vector<1x1x64x64xf32>
    %106 = vector.shape_cast %105 : vector<1x1x64x64xf32> to vector<64x64xf32>
    %c3_95 = arith.constant 3 : index
    %c0_96 = arith.constant 0 : index
    %107 = memref.load %arg3[%c3_95, %c0_96] : memref<8x4xf32, #tpu.memory_space<smem>>
    %108 = vector.broadcast %107 : f32 to vector<64x64xf32>
    %109 = arith.mulf %106, %108 : vector<64x64xf32>
    %c0_97 = arith.constant 0 : index
    %c1_98 = arith.constant 1 : index
    %c0_99 = arith.constant 0 : index
    %c0_100 = arith.constant 0 : index
    %110 = vector.load %arg2[%c0_97, %c1_98, %c0_99, %c0_100] : memref<1x4x64x64xf32, #tpu.memory_space<vmem>>, vector<1x1x64x64xf32>
    %111 = vector.shape_cast %110 : vector<1x1x64x64xf32> to vector<64x64xf32>
    %c3_101 = arith.constant 3 : index
    %c1_102 = arith.constant 1 : index
    %112 = memref.load %arg3[%c3_101, %c1_102] : memref<8x4xf32, #tpu.memory_space<smem>>
    %113 = vector.broadcast %112 : f32 to vector<64x64xf32>
    %114 = arith.mulf %111, %113 : vector<64x64xf32>
    %115 = arith.addf %109, %114 : vector<64x64xf32>
    %c0_103 = arith.constant 0 : index
    %c2_104 = arith.constant 2 : index
    %c0_105 = arith.constant 0 : index
    %c0_106 = arith.constant 0 : index
    %116 = vector.load %arg2[%c0_103, %c2_104, %c0_105, %c0_106] : memref<1x4x64x64xf32, #tpu.memory_space<vmem>>, vector<1x1x64x64xf32>
    %117 = vector.shape_cast %116 : vector<1x1x64x64xf32> to vector<64x64xf32>
    %c3_107 = arith.constant 3 : index
    %c2_108 = arith.constant 2 : index
    %118 = memref.load %arg3[%c3_107, %c2_108] : memref<8x4xf32, #tpu.memory_space<smem>>
    %119 = vector.broadcast %118 : f32 to vector<64x64xf32>
    %120 = arith.mulf %117, %119 : vector<64x64xf32>
    %121 = arith.addf %115, %120 : vector<64x64xf32>
    %c0_109 = arith.constant 0 : index
    %c3_110 = arith.constant 3 : index
    %c0_111 = arith.constant 0 : index
    %c0_112 = arith.constant 0 : index
    %122 = vector.load %arg2[%c0_109, %c3_110, %c0_111, %c0_112] : memref<1x4x64x64xf32, #tpu.memory_space<vmem>>, vector<1x1x64x64xf32>
    %123 = vector.shape_cast %122 : vector<1x1x64x64xf32> to vector<64x64xf32>
    %c3_113 = arith.constant 3 : index
    %c3_114 = arith.constant 3 : index
    %124 = memref.load %arg3[%c3_113, %c3_114] : memref<8x4xf32, #tpu.memory_space<smem>>
    %125 = vector.broadcast %124 : f32 to vector<64x64xf32>
    %126 = arith.mulf %123, %125 : vector<64x64xf32>
    %127 = arith.addf %121, %126 : vector<64x64xf32>
    %128 = vector.shape_cast %127 : vector<64x64xf32> to vector<2x32x64xf32>
    %cst_115 = arith.constant dense<0xFF800000> : vector<2x64xf32>
    %129 = vector.multi_reduction <maximumf>, %128, %cst_115 [1] : vector<2x32x64xf32> to vector<2x64xf32>
    %130 = vector.shape_cast %129 : vector<2x64xf32> to vector<2x2x32xf32>
    %cst_116 = arith.constant dense<0xFF800000> : vector<2x2xf32>
    %131 = vector.multi_reduction <maximumf>, %130, %cst_116 [2] : vector<2x2x32xf32> to vector<2x2xf32>
    %c3_117 = arith.constant 3 : index
    %132 = memref.load %arg4[%c3_117] : memref<8xf32, #tpu.memory_space<smem>>
    %133 = vector.broadcast %132 : f32 to vector<2x2xf32>
    %134 = arith.addf %131, %133 : vector<2x2xf32>
    %cst_118 = arith.constant 0.000000e+00 : f32
    %135 = vector.broadcast %cst_118 : f32 to vector<2x2xf32>
    %136 = arith.maximumf %134, %135 : vector<2x2xf32>
    %c0_119 = arith.constant 0 : index
    %c0_120 = arith.constant 0 : index
    %c3_121 = arith.constant 3 : index
    %c0_122 = arith.constant 0 : index
    %137 = vector.load %arg5[%c0_119, %c0_120, %c3_121, %c0_122] : memref<1x2x8x2xf32, #tpu.memory_space<vmem>>, vector<1x2x1x2xf32>
    %138 = vector.shape_cast %137 : vector<1x2x1x2xf32> to vector<2x2xf32>
    %139 = vector.shape_cast %136 : vector<2x2xf32> to vector<1x2x1x2xf32>
    tpu.vector_store %arg5[%c0_119, %c0_120, %c3_121, %c0_122], %139 {strides = array<i32>} : memref<1x2x8x2xf32, #tpu.memory_space<vmem>>, vector<1x2x1x2xf32>,
    %c0_123 = arith.constant 0 : index
    %c0_124 = arith.constant 0 : index
    %c0_125 = arith.constant 0 : index
    %c0_126 = arith.constant 0 : index
    %140 = vector.load %arg2[%c0_123, %c0_124, %c0_125, %c0_126] : memref<1x4x64x64xf32, #tpu.memory_space<vmem>>, vector<1x1x64x64xf32>
    %141 = vector.shape_cast %140 : vector<1x1x64x64xf32> to vector<64x64xf32>
    %c4 = arith.constant 4 : index
    %c0_127 = arith.constant 0 : index
    %142 = memref.load %arg3[%c4, %c0_127] : memref<8x4xf32, #tpu.memory_space<smem>>
    %143 = vector.broadcast %142 : f32 to vector<64x64xf32>
    %144 = arith.mulf %141, %143 : vector<64x64xf32>
    %c0_128 = arith.constant 0 : index
    %c1_129 = arith.constant 1 : index
    %c0_130 = arith.constant 0 : index
    %c0_131 = arith.constant 0 : index
    %145 = vector.load %arg2[%c0_128, %c1_129, %c0_130, %c0_131] : memref<1x4x64x64xf32, #tpu.memory_space<vmem>>, vector<1x1x64x64xf32>
    %146 = vector.shape_cast %145 : vector<1x1x64x64xf32> to vector<64x64xf32>
    %c4_132 = arith.constant 4 : index
    %c1_133 = arith.constant 1 : index
    %147 = memref.load %arg3[%c4_132, %c1_133] : memref<8x4xf32, #tpu.memory_space<smem>>
    %148 = vector.broadcast %147 : f32 to vector<64x64xf32>
    %149 = arith.mulf %146, %148 : vector<64x64xf32>
    %150 = arith.addf %144, %149 : vector<64x64xf32>
    %c0_134 = arith.constant 0 : index
    %c2_135 = arith.constant 2 : index
    %c0_136 = arith.constant 0 : index
    %c0_137 = arith.constant 0 : index
    %151 = vector.load %arg2[%c0_134, %c2_135, %c0_136, %c0_137] : memref<1x4x64x64xf32, #tpu.memory_space<vmem>>, vector<1x1x64x64xf32>
    %152 = vector.shape_cast %151 : vector<1x1x64x64xf32> to vector<64x64xf32>
    %c4_138 = arith.constant 4 : index
    %c2_139 = arith.constant 2 : index
    %153 = memref.load %arg3[%c4_138, %c2_139] : memref<8x4xf32, #tpu.memory_space<smem>>
    %154 = vector.broadcast %153 : f32 to vector<64x64xf32>
    %155 = arith.mulf %152, %154 : vector<64x64xf32>
    %156 = arith.addf %150, %155 : vector<64x64xf32>
    %c0_140 = arith.constant 0 : index
    %c3_141 = arith.constant 3 : index
    %c0_142 = arith.constant 0 : index
    %c0_143 = arith.constant 0 : index
    %157 = vector.load %arg2[%c0_140, %c3_141, %c0_142, %c0_143] : memref<1x4x64x64xf32, #tpu.memory_space<vmem>>, vector<1x1x64x64xf32>
    %158 = vector.shape_cast %157 : vector<1x1x64x64xf32> to vector<64x64xf32>
    %c4_144 = arith.constant 4 : index
    %c3_145 = arith.constant 3 : index
    %159 = memref.load %arg3[%c4_144, %c3_145] : memref<8x4xf32, #tpu.memory_space<smem>>
    %160 = vector.broadcast %159 : f32 to vector<64x64xf32>
    %161 = arith.mulf %158, %160 : vector<64x64xf32>
    %162 = arith.addf %156, %161 : vector<64x64xf32>
    %163 = vector.shape_cast %162 : vector<64x64xf32> to vector<2x32x64xf32>
    %cst_146 = arith.constant dense<0xFF800000> : vector<2x64xf32>
    %164 = vector.multi_reduction <maximumf>, %163, %cst_146 [1] : vector<2x32x64xf32> to vector<2x64xf32>
    %165 = vector.shape_cast %164 : vector<2x64xf32> to vector<2x2x32xf32>
    %cst_147 = arith.constant dense<0xFF800000> : vector<2x2xf32>
    %166 = vector.multi_reduction <maximumf>, %165, %cst_147 [2] : vector<2x2x32xf32> to vector<2x2xf32>
    %c4_148 = arith.constant 4 : index
    %167 = memref.load %arg4[%c4_148] : memref<8xf32, #tpu.memory_space<smem>>
    %168 = vector.broadcast %167 : f32 to vector<2x2xf32>
    %169 = arith.addf %166, %168 : vector<2x2xf32>
    %cst_149 = arith.constant 0.000000e+00 : f32
    %170 = vector.broadcast %cst_149 : f32 to vector<2x2xf32>
    %171 = arith.maximumf %169, %170 : vector<2x2xf32>
    %c0_150 = arith.constant 0 : index
    %c0_151 = arith.constant 0 : index
    %c4_152 = arith.constant 4 : index
    %c0_153 = arith.constant 0 : index
    %172 = vector.load %arg5[%c0_150, %c0_151, %c4_152, %c0_153] : memref<1x2x8x2xf32, #tpu.memory_space<vmem>>, vector<1x2x1x2xf32>
    %173 = vector.shape_cast %172 : vector<1x2x1x2xf32> to vector<2x2xf32>
    %174 = vector.shape_cast %171 : vector<2x2xf32> to vector<1x2x1x2xf32>
    tpu.vector_store %arg5[%c0_150, %c0_151, %c4_152, %c0_153], %174 {strides = array<i32>} : memref<1x2x8x2xf32, #tpu.memory_space<vmem>>, vector<1x2x1x2xf32>,
    %c0_154 = arith.constant 0 : index
    %c0_155 = arith.constant 0 : index
    %c0_156 = arith.constant 0 : index
    %c0_157 = arith.constant 0 : index
    %175 = vector.load %arg2[%c0_154, %c0_155, %c0_156, %c0_157] : memref<1x4x64x64xf32, #tpu.memory_space<vmem>>, vector<1x1x64x64xf32>
    %176 = vector.shape_cast %175 : vector<1x1x64x64xf32> to vector<64x64xf32>
    %c5 = arith.constant 5 : index
    %c0_158 = arith.constant 0 : index
    %177 = memref.load %arg3[%c5, %c0_158] : memref<8x4xf32, #tpu.memory_space<smem>>
    %178 = vector.broadcast %177 : f32 to vector<64x64xf32>
    %179 = arith.mulf %176, %178 : vector<64x64xf32>
    %c0_159 = arith.constant 0 : index
    %c1_160 = arith.constant 1 : index
    %c0_161 = arith.constant 0 : index
    %c0_162 = arith.constant 0 : index
    %180 = vector.load %arg2[%c0_159, %c1_160, %c0_161, %c0_162] : memref<1x4x64x64xf32, #tpu.memory_space<vmem>>, vector<1x1x64x64xf32>
    %181 = vector.shape_cast %180 : vector<1x1x64x64xf32> to vector<64x64xf32>
    %c5_163 = arith.constant 5 : index
    %c1_164 = arith.constant 1 : index
    %182 = memref.load %arg3[%c5_163, %c1_164] : memref<8x4xf32, #tpu.memory_space<smem>>
    %183 = vector.broadcast %182 : f32 to vector<64x64xf32>
    %184 = arith.mulf %181, %183 : vector<64x64xf32>
    %185 = arith.addf %179, %184 : vector<64x64xf32>
    %c0_165 = arith.constant 0 : index
    %c2_166 = arith.constant 2 : index
    %c0_167 = arith.constant 0 : index
    %c0_168 = arith.constant 0 : index
    %186 = vector.load %arg2[%c0_165, %c2_166, %c0_167, %c0_168] : memref<1x4x64x64xf32, #tpu.memory_space<vmem>>, vector<1x1x64x64xf32>
    %187 = vector.shape_cast %186 : vector<1x1x64x64xf32> to vector<64x64xf32>
    %c5_169 = arith.constant 5 : index
    %c2_170 = arith.constant 2 : index
    %188 = memref.load %arg3[%c5_169, %c2_170] : memref<8x4xf32, #tpu.memory_space<smem>>
    %189 = vector.broadcast %188 : f32 to vector<64x64xf32>
    %190 = arith.mulf %187, %189 : vector<64x64xf32>
    %191 = arith.addf %185, %190 : vector<64x64xf32>
    %c0_171 = arith.constant 0 : index
    %c3_172 = arith.constant 3 : index
    %c0_173 = arith.constant 0 : index
    %c0_174 = arith.constant 0 : index
    %192 = vector.load %arg2[%c0_171, %c3_172, %c0_173, %c0_174] : memref<1x4x64x64xf32, #tpu.memory_space<vmem>>, vector<1x1x64x64xf32>
    %193 = vector.shape_cast %192 : vector<1x1x64x64xf32> to vector<64x64xf32>
    %c5_175 = arith.constant 5 : index
    %c3_176 = arith.constant 3 : index
    %194 = memref.load %arg3[%c5_175, %c3_176] : memref<8x4xf32, #tpu.memory_space<smem>>
    %195 = vector.broadcast %194 : f32 to vector<64x64xf32>
    %196 = arith.mulf %193, %195 : vector<64x64xf32>
    %197 = arith.addf %191, %196 : vector<64x64xf32>
    %198 = vector.shape_cast %197 : vector<64x64xf32> to vector<2x32x64xf32>
    %cst_177 = arith.constant dense<0xFF800000> : vector<2x64xf32>
    %199 = vector.multi_reduction <maximumf>, %198, %cst_177 [1] : vector<2x32x64xf32> to vector<2x64xf32>
    %200 = vector.shape_cast %199 : vector<2x64xf32> to vector<2x2x32xf32>
    %cst_178 = arith.constant dense<0xFF800000> : vector<2x2xf32>
    %201 = vector.multi_reduction <maximumf>, %200, %cst_178 [2] : vector<2x2x32xf32> to vector<2x2xf32>
    %c5_179 = arith.constant 5 : index
    %202 = memref.load %arg4[%c5_179] : memref<8xf32, #tpu.memory_space<smem>>
    %203 = vector.broadcast %202 : f32 to vector<2x2xf32>
    %204 = arith.addf %201, %203 : vector<2x2xf32>
    %cst_180 = arith.constant 0.000000e+00 : f32
    %205 = vector.broadcast %cst_180 : f32 to vector<2x2xf32>
    %206 = arith.maximumf %204, %205 : vector<2x2xf32>
    %c0_181 = arith.constant 0 : index
    %c0_182 = arith.constant 0 : index
    %c5_183 = arith.constant 5 : index
    %c0_184 = arith.constant 0 : index
    %207 = vector.load %arg5[%c0_181, %c0_182, %c5_183, %c0_184] : memref<1x2x8x2xf32, #tpu.memory_space<vmem>>, vector<1x2x1x2xf32>
    %208 = vector.shape_cast %207 : vector<1x2x1x2xf32> to vector<2x2xf32>
    %209 = vector.shape_cast %206 : vector<2x2xf32> to vector<1x2x1x2xf32>
    tpu.vector_store %arg5[%c0_181, %c0_182, %c5_183, %c0_184], %209 {strides = array<i32>} : memref<1x2x8x2xf32, #tpu.memory_space<vmem>>, vector<1x2x1x2xf32>,
    %c0_185 = arith.constant 0 : index
    %c0_186 = arith.constant 0 : index
    %c0_187 = arith.constant 0 : index
    %c0_188 = arith.constant 0 : index
    %210 = vector.load %arg2[%c0_185, %c0_186, %c0_187, %c0_188] : memref<1x4x64x64xf32, #tpu.memory_space<vmem>>, vector<1x1x64x64xf32>
    %211 = vector.shape_cast %210 : vector<1x1x64x64xf32> to vector<64x64xf32>
    %c6 = arith.constant 6 : index
    %c0_189 = arith.constant 0 : index
    %212 = memref.load %arg3[%c6, %c0_189] : memref<8x4xf32, #tpu.memory_space<smem>>
    %213 = vector.broadcast %212 : f32 to vector<64x64xf32>
    %214 = arith.mulf %211, %213 : vector<64x64xf32>
    %c0_190 = arith.constant 0 : index
    %c1_191 = arith.constant 1 : index
    %c0_192 = arith.constant 0 : index
    %c0_193 = arith.constant 0 : index
    %215 = vector.load %arg2[%c0_190, %c1_191, %c0_192, %c0_193] : memref<1x4x64x64xf32, #tpu.memory_space<vmem>>, vector<1x1x64x64xf32>
    %216 = vector.shape_cast %215 : vector<1x1x64x64xf32> to vector<64x64xf32>
    %c6_194 = arith.constant 6 : index
    %c1_195 = arith.constant 1 : index
    %217 = memref.load %arg3[%c6_194, %c1_195] : memref<8x4xf32, #tpu.memory_space<smem>>
    %218 = vector.broadcast %217 : f32 to vector<64x64xf32>
    %219 = arith.mulf %216, %218 : vector<64x64xf32>
    %220 = arith.addf %214, %219 : vector<64x64xf32>
    %c0_196 = arith.constant 0 : index
    %c2_197 = arith.constant 2 : index
    %c0_198 = arith.constant 0 : index
    %c0_199 = arith.constant 0 : index
    %221 = vector.load %arg2[%c0_196, %c2_197, %c0_198, %c0_199] : memref<1x4x64x64xf32, #tpu.memory_space<vmem>>, vector<1x1x64x64xf32>
    %222 = vector.shape_cast %221 : vector<1x1x64x64xf32> to vector<64x64xf32>
    %c6_200 = arith.constant 6 : index
    %c2_201 = arith.constant 2 : index
    %223 = memref.load %arg3[%c6_200, %c2_201] : memref<8x4xf32, #tpu.memory_space<smem>>
    %224 = vector.broadcast %223 : f32 to vector<64x64xf32>
    %225 = arith.mulf %222, %224 : vector<64x64xf32>
    %226 = arith.addf %220, %225 : vector<64x64xf32>
    %c0_202 = arith.constant 0 : index
    %c3_203 = arith.constant 3 : index
    %c0_204 = arith.constant 0 : index
    %c0_205 = arith.constant 0 : index
    %227 = vector.load %arg2[%c0_202, %c3_203, %c0_204, %c0_205] : memref<1x4x64x64xf32, #tpu.memory_space<vmem>>, vector<1x1x64x64xf32>
    %228 = vector.shape_cast %227 : vector<1x1x64x64xf32> to vector<64x64xf32>
    %c6_206 = arith.constant 6 : index
    %c3_207 = arith.constant 3 : index
    %229 = memref.load %arg3[%c6_206, %c3_207] : memref<8x4xf32, #tpu.memory_space<smem>>
    %230 = vector.broadcast %229 : f32 to vector<64x64xf32>
    %231 = arith.mulf %228, %230 : vector<64x64xf32>
    %232 = arith.addf %226, %231 : vector<64x64xf32>
    %233 = vector.shape_cast %232 : vector<64x64xf32> to vector<2x32x64xf32>
    %cst_208 = arith.constant dense<0xFF800000> : vector<2x64xf32>
    %234 = vector.multi_reduction <maximumf>, %233, %cst_208 [1] : vector<2x32x64xf32> to vector<2x64xf32>
    %235 = vector.shape_cast %234 : vector<2x64xf32> to vector<2x2x32xf32>
    %cst_209 = arith.constant dense<0xFF800000> : vector<2x2xf32>
    %236 = vector.multi_reduction <maximumf>, %235, %cst_209 [2] : vector<2x2x32xf32> to vector<2x2xf32>
    %c6_210 = arith.constant 6 : index
    %237 = memref.load %arg4[%c6_210] : memref<8xf32, #tpu.memory_space<smem>>
    %238 = vector.broadcast %237 : f32 to vector<2x2xf32>
    %239 = arith.addf %236, %238 : vector<2x2xf32>
    %cst_211 = arith.constant 0.000000e+00 : f32
    %240 = vector.broadcast %cst_211 : f32 to vector<2x2xf32>
    %241 = arith.maximumf %239, %240 : vector<2x2xf32>
    %c0_212 = arith.constant 0 : index
    %c0_213 = arith.constant 0 : index
    %c6_214 = arith.constant 6 : index
    %c0_215 = arith.constant 0 : index
    %242 = vector.load %arg5[%c0_212, %c0_213, %c6_214, %c0_215] : memref<1x2x8x2xf32, #tpu.memory_space<vmem>>, vector<1x2x1x2xf32>
    %243 = vector.shape_cast %242 : vector<1x2x1x2xf32> to vector<2x2xf32>
    %244 = vector.shape_cast %241 : vector<2x2xf32> to vector<1x2x1x2xf32>
    tpu.vector_store %arg5[%c0_212, %c0_213, %c6_214, %c0_215], %244 {strides = array<i32>} : memref<1x2x8x2xf32, #tpu.memory_space<vmem>>, vector<1x2x1x2xf32>,
    %c0_216 = arith.constant 0 : index
    %c0_217 = arith.constant 0 : index
    %c0_218 = arith.constant 0 : index
    %c0_219 = arith.constant 0 : index
    %245 = vector.load %arg2[%c0_216, %c0_217, %c0_218, %c0_219] : memref<1x4x64x64xf32, #tpu.memory_space<vmem>>, vector<1x1x64x64xf32>
    %246 = vector.shape_cast %245 : vector<1x1x64x64xf32> to vector<64x64xf32>
    %c7 = arith.constant 7 : index
    %c0_220 = arith.constant 0 : index
    %247 = memref.load %arg3[%c7, %c0_220] : memref<8x4xf32, #tpu.memory_space<smem>>
    %248 = vector.broadcast %247 : f32 to vector<64x64xf32>
    %249 = arith.mulf %246, %248 : vector<64x64xf32>
    %c0_221 = arith.constant 0 : index
    %c1_222 = arith.constant 1 : index
    %c0_223 = arith.constant 0 : index
    %c0_224 = arith.constant 0 : index
    %250 = vector.load %arg2[%c0_221, %c1_222, %c0_223, %c0_224] : memref<1x4x64x64xf32, #tpu.memory_space<vmem>>, vector<1x1x64x64xf32>
    %251 = vector.shape_cast %250 : vector<1x1x64x64xf32> to vector<64x64xf32>
    %c7_225 = arith.constant 7 : index
    %c1_226 = arith.constant 1 : index
    %252 = memref.load %arg3[%c7_225, %c1_226] : memref<8x4xf32, #tpu.memory_space<smem>>
    %253 = vector.broadcast %252 : f32 to vector<64x64xf32>
    %254 = arith.mulf %251, %253 : vector<64x64xf32>
    %255 = arith.addf %249, %254 : vector<64x64xf32>
    %c0_227 = arith.constant 0 : index
    %c2_228 = arith.constant 2 : index
    %c0_229 = arith.constant 0 : index
    %c0_230 = arith.constant 0 : index
    %256 = vector.load %arg2[%c0_227, %c2_228, %c0_229, %c0_230] : memref<1x4x64x64xf32, #tpu.memory_space<vmem>>, vector<1x1x64x64xf32>
    %257 = vector.shape_cast %256 : vector<1x1x64x64xf32> to vector<64x64xf32>
    %c7_231 = arith.constant 7 : index
    %c2_232 = arith.constant 2 : index
    %258 = memref.load %arg3[%c7_231, %c2_232] : memref<8x4xf32, #tpu.memory_space<smem>>
    %259 = vector.broadcast %258 : f32 to vector<64x64xf32>
    %260 = arith.mulf %257, %259 : vector<64x64xf32>
    %261 = arith.addf %255, %260 : vector<64x64xf32>
    %c0_233 = arith.constant 0 : index
    %c3_234 = arith.constant 3 : index
    %c0_235 = arith.constant 0 : index
    %c0_236 = arith.constant 0 : index
    %262 = vector.load %arg2[%c0_233, %c3_234, %c0_235, %c0_236] : memref<1x4x64x64xf32, #tpu.memory_space<vmem>>, vector<1x1x64x64xf32>
    %263 = vector.shape_cast %262 : vector<1x1x64x64xf32> to vector<64x64xf32>
    %c7_237 = arith.constant 7 : index
    %c3_238 = arith.constant 3 : index
    %264 = memref.load %arg3[%c7_237, %c3_238] : memref<8x4xf32, #tpu.memory_space<smem>>
    %265 = vector.broadcast %264 : f32 to vector<64x64xf32>
    %266 = arith.mulf %263, %265 : vector<64x64xf32>
    %267 = arith.addf %261, %266 : vector<64x64xf32>
    %268 = vector.shape_cast %267 : vector<64x64xf32> to vector<2x32x64xf32>
    %cst_239 = arith.constant dense<0xFF800000> : vector<2x64xf32>
    %269 = vector.multi_reduction <maximumf>, %268, %cst_239 [1] : vector<2x32x64xf32> to vector<2x64xf32>
    %270 = vector.shape_cast %269 : vector<2x64xf32> to vector<2x2x32xf32>
    %cst_240 = arith.constant dense<0xFF800000> : vector<2x2xf32>
    %271 = vector.multi_reduction <maximumf>, %270, %cst_240 [2] : vector<2x2x32xf32> to vector<2x2xf32>
    %c7_241 = arith.constant 7 : index
    %272 = memref.load %arg4[%c7_241] : memref<8xf32, #tpu.memory_space<smem>>
    %273 = vector.broadcast %272 : f32 to vector<2x2xf32>
    %274 = arith.addf %271, %273 : vector<2x2xf32>
    %cst_242 = arith.constant 0.000000e+00 : f32
    %275 = vector.broadcast %cst_242 : f32 to vector<2x2xf32>
    %276 = arith.maximumf %274, %275 : vector<2x2xf32>
    %c0_243 = arith.constant 0 : index
    %c0_244 = arith.constant 0 : index
    %c7_245 = arith.constant 7 : index
    %c0_246 = arith.constant 0 : index
    %277 = vector.load %arg5[%c0_243, %c0_244, %c7_245, %c0_246] : memref<1x2x8x2xf32, #tpu.memory_space<vmem>>, vector<1x2x1x2xf32>
    %278 = vector.shape_cast %277 : vector<1x2x1x2xf32> to vector<2x2xf32>
    %279 = vector.shape_cast %276 : vector<2x2xf32> to vector<1x2x1x2xf32>
    tpu.vector_store %arg5[%c0_243, %c0_244, %c7_245, %c0_246], %279 {strides = array<i32>} : memref<1x2x8x2xf32, #tpu.memory_space<vmem>>, vector<1x2x1x2xf32>,
    return
  }
  func.func @transform_0(%arg0: i32, %arg1: i32) -> (i32, i32, i32, i32) {
    %c0_i32 = arith.constant 0 : i32
    %c0_i32_0 = arith.constant 0 : i32
    %c0_i32_1 = arith.constant 0 : i32
    return %arg0, %c0_i32, %arg1, %c0_i32_0 : i32, i32, i32, i32
  }
  func.func @transform_1(%arg0: i32, %arg1: i32) -> (i32, i32) {
    %c0_i32 = arith.constant 0 : i32
    %c0_i32_0 = arith.constant 0 : i32
    %c0_i32_1 = arith.constant 0 : i32
    return %c0_i32, %c0_i32_0 : i32, i32
  }
  func.func @transform_2(%arg0: i32, %arg1: i32) -> i32 {
    %c0_i32 = arith.constant 0 : i32
    %c0_i32_0 = arith.constant 0 : i32
    return %c0_i32 : i32
  }
  func.func @transform_3(%arg0: i32, %arg1: i32) -> (i32, i32, i32, i32) {
    %c0_i32 = arith.constant 0 : i32
    %c0_i32_0 = arith.constant 0 : i32
    %c0_i32_1 = arith.constant 0 : i32
    return %arg0, %arg1, %c0_i32, %c0_i32_0 : i32, i32, i32, i32
  }
}

</mosaic_0001>

<bundles_post_ra>
// kernel: tpu_custom_call.1
= control target key start
LH: loop header
LB: loop body
LE: loop exit
PB: predicated region body
PF: predicated region fallthrough
CT: control target
= control target key end

     0   :  { %8 = vsyncpa [#allocation3], 0  ;;  %s3309_s0 = inlined_call_operand.hbm [shape: f32[2,4,64,64], index: 0, kind: input, shape index: {}]   ;;  %s3310_s1 = inlined_call_operand.vmem [shape: f32[8,4], index: 1, kind: input, shape index: {}]   ;;  %s3311_s2 = inlined_call_operand.vmem [shape: f32[8], index: 2, kind: input, shape index: {}]   ;;  %s3312_s3 = inlined_call_operand.vmem [shape: f32[2,2,8,2], index: 3, kind: output, shape index: {}]  }
   0x1   :  { %10 = vsyncpa [#allocation3 + $0x1], 0 }
   0x2   :  { %11 = vsyncpa [#allocation4], 0 }
   0x3   :  { %12 = vsyncpa [#allocation7], 0  ;;  %s2202_s12 = smov 0   ;;  %s2204_s13 = smov 0  }
   0x4   :  { %s2206_s14 = smov 0   ;;  %s2208_s15 = smov 0  }
   0x5   :  { %s2210_s16 = smov 0   ;;  %s2212_s17 = smov 0  }
   0x6 LB: > { %s1724_s18 = sadd.s32 4294967295, %s2172_s17   ;;  %s39_s19 = sadd.s32 1, %s2160_s14  ;;  %s2172_s17 = sphi %s2212_s17, %s18_s17   ;;  %s2168_s16 = sphi %s2210_s16, %s3358_s16   ;;  %s2164_s15 = sphi %s2208_s15, %s3357_s15   ;;  %s2160_s14 = sphi %s2206_s14, %s3356_s14   ;;  %s2156_s13 = sphi %s2204_s13, %s3355_s13   ;;  %s2152_s12 = sphi %s2202_s12, %s3354_s12  }
   0x7   : > { %p46_p0 = scmp.ne.s32.totalorder %s2160_s14, %s2156_s13  ;;  %p47_p1 = scmp.eq.s32.totalorder %s2172_s17, 0 }
   0x8   : > { %p52_p2 = scmp.ne.s32.totalorder %s2156_s13, %s2152_s12  ;;  %p2236_p3 = scmp.eq.s32.totalorder %s1724_s18, 0 }
   0x9   : > { %p48_p4 = por %p47_p1, %p46_p0  ;;  %p1726_p5 = scmp.ge.s32.totalorder %s2172_s17, 1 }
   0xa   : > { %s3327_s20 = scalar_select %p2236_p3, 1, 0 }
   0xb   : > { %p2243_p6 = por %p2236_p3, %p52_p2  ;;  %p133_p7 = scmp.lt.s32.totalorder %s2172_s17, 3 }
   0xc   : > { %s146_s24 = sshll.u32 %s3310_s1, 4  ;;  %p1996_p10 = scmp.lt.s32.totalorder %s2172_s17, 2  ;;  %s147_s24 = int_to_ptr.vmem [resolvable:$true] %s146_s24 }
   0xd   : > { %s3328_s21 = scalar_select %p2243_p6, 1, 0 }
   0xe   : > { %p2251_p8 = pnand %p1726_p5, %p133_p7  ;;  %s157_s28 = sshll.u32 %s3311_s2, 4  ;;  %s158_s28 = int_to_ptr.vmem [resolvable:$true] %s157_s28 }
   0xf   : > { %p2267_p12 = pnand %p1996_p10, %p48_p4  ;;  %s2054_s4 = scalar_lea.vmem %s147_s24, 128 }
  0x10   : > { %s3329_s25 = scalar_select %p2251_p8, 1, 0 }
  0x11   : > { %p1983_p9 = pneg %p2251_p8  ;;  %p2055_p13 = scmp.ne.s32.totalorder %s147_s24, %s2054_s4 }
  0x12   : > { %s3331_s30 = scalar_select %p2267_p12, 1, 0 }
  0x13   : > { %p2263_p11 = pnand %p1983_p9, %p2236_p3  ;;  %p2062_p5 = scmp.lt.s32.totalorder %s147_s24, %s147_s24 }
  0x14   : > { %p2063_p7 = scmp.lt.s32.totalorder %s2054_s4, %s2054_s4 }
  0x15   : > { %p2056_p0 = pneg %p2263_p11 }
  0x16   : > { %p2064_p6 = por %p2063_p7, %p2062_p5 }
  0x17   : > { %p2057_p1 = pnand %p2056_p0, %p2055_p13 }
  0x19   : > { %p2058_p2 = pneg %p2057_p1 }
  0x1b   : > { %p2065_p8 = pnand %p2064_p6, %p2058_p2 }
  0x1d   : > { %2068 = shalt.err (!%p2065_p8)
}
  0x1e   : > { %s2174_s5 = smov [#allocation5]   ;;  %s2069_s6 = scalar_lea.vmem %s158_s28, 16 }
  0x1f   : > { %1986 = dma.vmem_to_smem (!%p2263_p11), %s147_s24, 128, %s2174_s5, [#allocation4]  }
  0x20   : > { %p2070_p4 = scmp.ne.s32.totalorder %s158_s28, %s2069_s6  ;;  %p2077_p3 = scmp.lt.s32.totalorder %s158_s28, %s158_s28 }
  0x21   : > { %p2078_p12 = scmp.lt.s32.totalorder %s2069_s6, %s2069_s6 }
  0x22   : > { %p2072_p9 = pnand %p2070_p4, %p2056_p0 }
  0x23   : > { %p2079_p13 = por %p2078_p12, %p2077_p3 }
  0x24   : > { %p2073_p10 = pneg %p2072_p9 }
  0x26   : > { %p2080_p1 = pnand %p2079_p13, %p2073_p10 }
  0x28   : > { %2083 = shalt.err (!%p2080_p1)
}
  0x29   : > { %s2175_s7 = smov [#allocation6]   ;;  %s168_s8 = sand.u32 1, %s2160_s14  }
  0x2a   : > { %1989 = dma.vmem_to_smem (!%p2263_p11), %s158_s28, 16, %s2175_s7, [#allocation7]  }
  0x2b   : > { %s30_s9 = sadd.s32 1, %s2168_s16  ;;  %s1730_s10 = sshll.u32 %s168_s8, 8 }
  0x2c   : > { %p32_p6 = scmp.ge.s32.totalorder %s30_s9, 2  ;;  %s1971_s11 = sshll.u32 %s2168_s16, 12 }
  0x2d   : > { %s2285_s22 = scalar_lea.hbm %s3309_s0, %s1971_s11  ;;  %s172_s23 = scalar_lea.vmem [#allocation2], %s1730_s10 }
  0x2e   : > { %s3360_s9 = smov (%p32_p6, %s30_s9), 0  ;;  %s181_s24 = sshll.u32 %s172_s23, 4  ;;  %s2289_s24 = int_to_ptr.vmem [resolvable:$true] %s181_s24 }
  0x2f   : > { %s34_s26 = ssub.s32 %s2168_s16, %s3360_s9  ;;  %s2296_s28 = scalar_lea.sflag [#allocation3], %s168_s8 }
  0x30   : > { %p37_p3 = scmp.eq.s32.totalorder %s34_s26, 0  ;;  %s2084_s29 = scalar_lea.hbm %s2285_s22, 4096 }
  0x31   : > { %p2085_p8 = scmp.ne.s32.totalorder %s2285_s22, %s2084_s29  ;;  %p3332_p11 = scmp.ne.s32.totalorder %s3331_s30, 0 }
  0x32   : > { %s2294_s27 = scalar_select %p37_p3, %s2160_s14, %s39_s19  }
  0x33   : > { %p2086_p12 = pneg %p3332_p11  ;;  %s2089_s6 = scalar_lea.hbm %s3309_s0, 8192 }
  0x34   : > { %p2090_p5 = scmp.lt.u32.totalorder %s2285_s22, %s3309_s0  ;;  %p2091_p7 = scmp.lt.u32.totalorder %s2089_s6, %s2084_s29 }
  0x35   : > { %p2087_p0 = pnand %p2086_p12, %p2085_p8  ;;  %p2093_p9 = scmp.lt.u32.totalorder %s2084_s29, %s2285_s22 }
  0x36   : > { %p2092_p4 = por %p2091_p7, %p2090_p5 }
  0x37   : > { %p2088_p2 = pneg %p2087_p0 }
  0x38   : > { %p2094_p10 = por %p2093_p9, %p2092_p4 }
  0x3a   : > { %p2095_p13 = pnand %p2094_p10, %p2088_p2 }
  0x3c   : > { %2098 = shalt.err (!%p2095_p13)
}
  0x3d   : > { %s2099_s19 = scalar_lea.vmem %s2289_s24, 4096  ;;  %s2176_s8 = smov [#allocation2]  }
  0x3e   : > { %p2100_p1 = scmp.ne.s32.totalorder %s2289_s24, %s2099_s19  ;;  %s2104_s11 = sshll.u32 %s2176_s8, 4  ;;  %s2105_s11 = int_to_ptr.vmem [resolvable:$false] %s2104_s11 }
  0x3f   : > { %s2106_s12 = scalar_lea.vmem %s2105_s11, 8192  ;;  %p2107_p8 = scmp.lt.s32.totalorder %s2289_s24, %s2105_s11 }
  0x40   : > { %p2102_p6 = pnand %p2100_p1, %p2086_p12  ;;  %p2108_p0 = scmp.lt.s32.totalorder %s2106_s12, %s2099_s19 }
  0x42   : > { %p2103_p3 = pneg %p2102_p6  ;;  %p2109_p5 = por %p2108_p0, %p2107_p8 }
  0x44   : > { %p2110_p7 = pnand %p2109_p5, %p2103_p3 }
  0x46   : > { %2113 = shalt.err (!%p2110_p7)
}
  0x47   : > { %s2177_s18 = smov 128   ;;  %s2178_s23 = smov 8  }
  0x48   : > { %1993 = dma.hbm_to_vmem [thread:$0]  (!%p3332_p11), %s2285_s22, 4096, %s2289_s24, %s2296_s28, %s2177_s18, %s2177_s18, %s2178_s23  }
  0x49   : > { %p3333_p12 = scmp.ne.s32.totalorder %s3329_s25, 0 }
  0x4b   : > { %193 = sbr.rel (%p3333_p12) target bundleno = 559 (0x22f), region = 32 }
  0x52   : > { %s195_s26 = sand.u32 1, %s2156_s13   ;;  %p3334_p2 = scmp.ne.s32.totalorder %s3328_s21, 0 }
  0x53   : > { %s1734_s29 = sshll.u32 %s195_s26, 8  ;;  %s196_s4 = scalar_lea.sflag [#allocation3], %s195_s26 }
  0x54   : > { %s2327_s5 = scalar_lea.vmem [#allocation2], %s1734_s29 }
  0x55   : > { %2139 = dma.done.wait (%p3334_p2), %s196_s4, 4096  }
  0x56   : > { %2141 = vsyncadd (%p3334_p2), %s196_s4, 4294963200  ;;  %p3335_p4 = scmp.ne.s32.totalorder %s3327_s20, 0 }
  0x58   : > { %2143 = dma.done.wait (%p3335_p4), [#allocation4], 128  }
  0x59   : > { %2145 = vsyncadd (%p3335_p4), [#allocation4], 4294967168 }
  0x5a   : > { %2147 = dma.done.wait (%p3335_p4), [#allocation7], 16  }
  0x5b   : > { %2149 = vsyncadd (%p3335_p4), [#allocation7], 4294967280 }
  0x5c   : > { %212 = sfence }
  0x5d   : > { %s254_s25 = sld [smem:[#allocation5]]  ;;  %s1747_s21 = sld [smem:[#allocation5 + $0x1]]  ;;  %v2342_v0 = vld [vmem:[%s2327_s5] sm:$0xff]  ;;  %v2345_v1 = vld [vmem:[%s2327_s5 + $0x8] sm:$0xff]  ;;  %v2348_v2 = vld [vmem:[%s2327_s5 + $0x10] sm:$0xff]  ;;  %vm345_vm0 = vcmask 523264  }
  0x5e   : > { %s1756_s30 = sld [smem:[#allocation5 + $0x2]]  ;;  %v2351_v3 = vld [vmem:[%s2327_s5 + $0x18] sm:$0xff]  ;;  %v2354_v4 = vld [vmem:[%s2327_s5 + $0x40] sm:$0xff]  ;;  %s2356_s20 = sld [smem:[#allocation5 + $0x3]]  ;;  %v2359_v5 = vld [vmem:[%s2327_s5 + $0x48] sm:$0xff]  ;;  %vm379_vm1 = vcmask 1041409  }
  0x5f   : > { %v2362_v6 = vld [vmem:[%s2327_s5 + $0x20] sm:$0xff]  ;;  %v2365_v7 = vld [vmem:[%s2327_s5 + $0x28] sm:$0xff]  ;;  %v2368_v9 = vld [vmem:[%s2327_s5 + $0x50] sm:$0xff]  ;;  %s2446_s22 = sld [smem:[#allocation5 + $0x80]]  ;;  %s2457_s24 = sld [smem:[#allocation5 + $0x81]]  ;;  %vm394_vm2 = vcmask 254976  }
  0x60   : > { %v2371_v10 = vld [vmem:[%s2327_s5 + $0x58] sm:$0xff]  ;;  %v2374_v11 = vld [vmem:[%s2327_s5 + $0x80] sm:$0xff]  ;;  %v2381_v16 = vld [vmem:[%s2327_s5 + $0x88] sm:$0xff]  ;;  %s2470_s28 = sld [smem:[#allocation5 + $0x82]]  ;;  %s2497_s6 = sld [smem:[#allocation5 + $0x83]]  ;;  %vm421_vm3 = vcmask 8192  }
  0x61   : > { %v2384_v17 = vld [vmem:[%s2327_s5 + $0x90] sm:$0xff]  ;;  %v2387_v18 = vld [vmem:[%s2327_s5 + $0x98] sm:$0xff]  ;;  %v2404_v29 = vld [vmem:[%s2327_s5 + $0x60] sm:$0xff]  ;;  %s2179_s7 = smov 96   ;;  %s2534_s10 = sld [smem:[#allocation5 + $0x100]] }
  0x62   : > { %v2398_v27 = vld [vmem:[%s2327_s5 + $0x30] sm:$0xff]  ;;  %v2401_v28 = vld [vmem:[%s2327_s5 + $0x38] sm:$0xff]  ;;  %v2415_v34 = vld [vmem:[%s2327_s5 + $0xc0] sm:$0xff]  ;;  %s2539_s19 = sld [smem:[#allocation5 + $0x101]]  ;;  %s2541_s8 = sld [smem:[#allocation5 + $0x102]] }
  0x63   : > { %v255_v8 = vstv %s254_s25  ;;  %v274_v19 = vstv %s1747_s21  ;;  %v2418_v39 = vld [vmem:[%s2327_s5 + $0xc8] sm:$0xff]  ;;  %v2421_v40 = vld [vmem:[%s2327_s5 + $0xd0] sm:$0xff]  ;;  %s2569_s11 = sld [smem:[#allocation5 + $0x103]]  ;;  %s2604_s12 = sld [smem:[#allocation5 + $0x180]] }
  0x64   : > { %v256_v12 = vmul.f32 %v255_v8, %v2342_v0  ;;  %v257_v13 = vmul.f32 %v255_v8, %v2345_v1  ;;  %v258_v14 = vmul.f32 %v255_v8, %v2348_v2  ;;  %v259_v15 = vmul.f32 %v255_v8, %v2351_v3  ;;  %v2424_v41 = vld [vmem:[%s2327_s5 + $0xd8] sm:$0xff]  ;;  %v2430_v45 = vld [vmem:[%s2327_s5 + $0x68] sm:$0xff]  ;;  %v2433_v46 = vld [vmem:[%s2327_s5 + $0x70] sm:$0xff]  ;;  %s2612_s18 = sld [smem:[#allocation5 + $0x181]]  ;;  %s2626_s23 = sld [smem:[#allocation5 + $0x182]] }
  0x65   : > { %v2389_v20 = vstv %s1756_s30  ;;  %v260_v21 = vmul.f32 %v255_v8, %v2362_v6  ;;  %v261_v22 = vmul.f32 %v255_v8, %v2365_v7  ;;  %v275_v23 = vmul.f32 %v2354_v4, %v274_v19  ;;  %v2436_v47 = vld [vmem:[%s2327_s5 + $0x78] sm:$0xff]  ;;  %v2444_v57 = vld [vmem:[%s2327_s5 + $0xa0] sm:$0xff]  ;;  %s2628_s26 = sld [smem:[#allocation5 + $0x183]]  ;;  %s2675_s29 = sld [smem:[#allocation5 + $0x200]] }
  0x66   : > { %v276_v24 = vmul.f32 %v2359_v5, %v274_v19  ;;  %v277_v25 = vmul.f32 %v2368_v9, %v274_v19  ;;  %v278_v26 = vmul.f32 %v2371_v10, %v274_v19  ;;  %v302_v30 = vmul.f32 %v2374_v11, %v2389_v20  ;;  %s2683_s4 = sld [smem:[#allocation5 + $0x201]]  ;;  %s2690_s25 = sld [smem:[#allocation5 + $0x202]] }
  0x67   : > { %v303_v31 = vmul.f32 %v2381_v16, %v2389_v20  ;;  %v304_v32 = vmul.f32 %v2384_v17, %v2389_v20  ;;  %v305_v33 = vmul.f32 %v2387_v18, %v2389_v20  ;;  %v283_v35 = vadd.f32 %v275_v23, %v256_v12  ;;  %s2705_s21 = sld [smem:[#allocation5 + $0x203]]  ;;  %s2787_s30 = sld [smem:[#allocation5 + $0x280]] }
  0x68   : > { %v284_v36 = vadd.f32 %v276_v24, %v257_v13  ;;  %v285_v37 = vadd.f32 %v277_v25, %v258_v14  ;;  %v286_v38 = vadd.f32 %v278_v26, %v259_v15  ;;  %v328_v42 = vstv %s2356_s20  ;;  %v2452_v13 = vld [vmem:[%s2327_s5 + $0xa8] sm:$0xff]  ;;  %v2455_v14 = vld [vmem:[%s2327_s5 + $0xb0] sm:$0xff]  ;;  %v2460_v25 = vld [vmem:[%s2327_s5 + $0xb8] sm:$0xff]  ;;  %s2789_s20 = sld [smem:[#allocation5 + $0x281]]  ;;  %p237_p11 = scmp.lt.s32.totalorder %s2164_s15, 1 }
  0x69   : > { %v262_v43 = vmul.f32 %v255_v8, %v2398_v27  ;;  %v263_v44 = vmul.f32 %v255_v8, %v2401_v28  ;;  %v279_v48 = vmul.f32 %v2404_v29, %v274_v19  ;;  %v310_v49 = vadd.f32 %v302_v30, %v283_v35  ;;  %v2468_v26 = vld [vmem:[%s2327_s5 + $0xe8] sm:$0xff] }
  0x6a   : > { %v311_v50 = vadd.f32 %v303_v31, %v284_v36  ;;  %v312_v51 = vadd.f32 %v304_v32, %v285_v37  ;;  %v313_v52 = vadd.f32 %v305_v33, %v286_v38  ;;  %v329_v53 = vmul.f32 %v2415_v34, %v328_v42  ;;  %v2477_v33 = vld [vmem:[%s2327_s5 + $0xf0] sm:$0xff]  ;;  %s3362_s15 = smov (!%p237_p11, %s2164_s15), 1 }
  0x6b   : > { %v330_v54 = vmul.f32 %v2418_v39, %v328_v42  ;;  %v331_v55 = vmul.f32 %v2421_v40, %v328_v42  ;;  %v332_v56 = vmul.f32 %v2424_v41, %v328_v42  ;;  %v280_v58 = vmul.f32 %v2430_v45, %v274_v19 }
  0x6c   : > { %v281_v59 = vmul.f32 %v2433_v46, %v274_v19  ;;  %v282_v60 = vmul.f32 %v2436_v47, %v274_v19  ;;  %v287_v61 = vadd.f32 %v279_v48, %v260_v21  ;;  %v337_v62 = vadd.f32 %v329_v53, %v310_v49  ;;  %v2465_v21 = vld [vmem:[%s2327_s5 + $0xe0] sm:$0xff] }
  0x6d   : > { %v338_v63 = vadd.f32 %v330_v54, %v311_v50  ;;  %v339_v8 = vadd.f32 %v331_v55, %v312_v51  ;;  %v340_v12 = vadd.f32 %v332_v56, %v313_v52  ;;  %v288_v15 = vadd.f32 %v280_v58, %v261_v22 }
  0x6e   : > { %v289_v23 = vadd.f32 %v281_v59, %v262_v43  ;;  %v290_v24 = vadd.f32 %v282_v60, %v263_v44  ;;  %v306_v19 = vmul.f32 %v2444_v57, %v2389_v20  ;;  %v346_v30 = vsel %vm345_vm0, %v337_v62, -inf  ;;  %v2484_v43 = vld [vmem:[%s2327_s5 + $0xf8] sm:$0xff] }
  0x6f   : > { %v347_v31 = vsel %vm345_vm0, %v338_v63, -inf  ;;  %v348_v22 = vsel %vm345_vm0, %v339_v8, -inf  ;;  %v350_v32 = vsel %vm345_vm0, %v340_v12, -inf  ;;  %v307_v37 = vmul.f32 %v2452_v13, %v2389_v20 }
  0x70   : > { %v349_v35 = vmax.f32 %v346_v30, %v348_v22  ;;  %v351_v36 = vmax.f32 %v347_v31, %v350_v32  ;;  %v308_v38 = vmul.f32 %v2455_v14, %v2389_v20  ;;  %v309_v44 = vmul.f32 %v2460_v25, %v2389_v20 }
  0x71   : > { %v314_v48 = vadd.f32 %v306_v19, %v287_v61  ;;  %v333_v49 = vmul.f32 %v2465_v21, %v328_v42  ;;  %v334_v50 = vmul.f32 %v2468_v26, %v328_v42  ;;  %v315_v52 = vadd.f32 %v307_v37, %v288_v15 }
  0x72   : > { %v352_v51 = vmax.f32 %v349_v35, %v351_v36  ;;  %v316_v53 = vadd.f32 %v308_v38, %v289_v23  ;;  %v335_v54 = vmul.f32 %v2477_v33, %v328_v42  ;;  %v317_v55 = vadd.f32 %v309_v44, %v290_v24 }
  0x73   : > { %v336_v56 = vmul.f32 %v2484_v43, %v328_v42  ;;  %v341_v58 = vadd.f32 %v333_v49, %v314_v48  ;;  %v433_v59 = vstv %s2446_s22  ;;  %v342_v62 = vadd.f32 %v334_v50, %v315_v52  ;;  %s2830_s22 = sld [smem:[#allocation5 + $0x282]] }
  0x74   : > { %v353_v60 = vrot.slane %v352_v51, 4  ;;  %v343_v20 = vadd.f32 %v335_v54, %v316_v53  ;;  %v438_v61 = vmul.f32 %v433_v59, %v2362_v6  ;;  %v439_v12 = vmul.f32 %v433_v59, %v2365_v7 }
  0x75   : > { %v344_v63 = vadd.f32 %v336_v56, %v317_v55  ;;  %v359_v8 = vsel %vm345_vm0, %v341_v58, -inf  ;;  %v440_v15 = vmul.f32 %v433_v59, %v2398_v27  ;;  %v360_v42 = vsel %vm345_vm0, %v342_v62, -inf }
  0x76   : > { %v354_v23 = vmax.f32 %v352_v51, %v353_v60  ;;  %v361_v24 = vsel %vm345_vm0, %v343_v20, -inf  ;;  %v441_v19 = vmul.f32 %v433_v59, %v2401_v28  ;;  %v451_v22 = vstv %s2457_s24  ;;  %s2867_s24 = sld [smem:[#allocation5 + $0x283]] }
  0x77   : > { %v362_v30 = vmax.f32 %v359_v8, %v361_v24  ;;  %v363_v31 = vsel %vm345_vm0, %v344_v63, -inf  ;;  %v2505_v32 = vstv %s2470_s28  ;;  %v456_v37 = vmul.f32 %v2404_v29, %v451_v22  ;;  %s2869_s28 = sld [smem:[#allocation5 + $0x300]] }
  0x78   : > { %v355_v35 = vrot.slane %v354_v23, 2  ;;  %v364_v36 = vmax.f32 %v360_v42, %v363_v31  ;;  %v457_v38 = vmul.f32 %v2430_v45, %v451_v22  ;;  %v458_v44 = vmul.f32 %v2433_v46, %v451_v22 }
  0x79   : > { %v459_v48 = vmul.f32 %v2436_v47, %v451_v22  ;;  %v482_v49 = vmul.f32 %v2444_v57, %v2505_v32  ;;  %v483_v50 = vmul.f32 %v2452_v13, %v2505_v32  ;;  %v464_v53 = vadd.f32 %v456_v37, %v438_v61 }
  0x7a   : > { %v356_v51 = vmax.f32 %v354_v23, %v355_v35  ;;  %v365_v52 = vmax.f32 %v362_v30, %v364_v36  ;;  %v465_v54 = vadd.f32 %v457_v38, %v439_v12  ;;  %v466_v55 = vadd.f32 %v458_v44, %v440_v15 }
  0x7b   : > { %v467_v56 = vadd.f32 %v459_v48, %v441_v19  ;;  %v484_v58 = vmul.f32 %v2455_v14, %v2505_v32  ;;  %v485_v60 = vmul.f32 %v2460_v25, %v2505_v32  ;;  %v490_v63 = vadd.f32 %v482_v49, %v464_v53 }
  0x7c   : > { %v357_v62 = vrot.slane %v356_v51, 1  ;;  %v366_v20 = vrot.slane %v365_v52, 4  ;;  %v491_v8 = vadd.f32 %v483_v50, %v465_v54  ;;  %v503_v31 = vstv %s2497_s6  ;;  %s2911_s6 = sld [smem:[#allocation5 + $0x301]] }
  0x7d   : > { %v492_v42 = vadd.f32 %v484_v58, %v466_v55  ;;  %v493_v24 = vadd.f32 %v485_v60, %v467_v56  ;;  %v434_v23 = vmul.f32 %v433_v59, %v2342_v0  ;;  %v508_v12 = vmul.f32 %v2465_v21, %v503_v31 }
  0x7e   : > { %v2521_v30 = vmax.f32 %v356_v51, %v357_v62  ;;  %v367_v61 = vmax.f32 %v365_v52, %v366_v20  ;;  %v509_v15 = vmul.f32 %v2468_v26, %v503_v31  ;;  %v510_v19 = vmul.f32 %v2477_v33, %v503_v31 }
  0x7f   : > { %v511_v35 = vmul.f32 %v2484_v43, %v503_v31  ;;  %v435_v36 = vmul.f32 %v433_v59, %v2345_v1  ;;  %v436_v37 = vmul.f32 %v433_v59, %v2348_v2  ;;  %v516_v44 = vadd.f32 %v508_v12, %v490_v63 }
  0x80   : > { %3336 = vst [vmem:[#allocation11_spill] sm:$0xff] %v2521_v30  ;;  %374 = vrot.lane.b32.xlu0 %v2521_v30, %s2179_s7  ;;  %v368_v38 = vrot.slane %v367_v61, 2  ;;  %v517_v48 = vadd.f32 %v509_v15, %v491_v8  ;;  %v437_v49 = vmul.f32 %v433_v59, %v2351_v3  ;;  %v518_v50 = vadd.f32 %v510_v19, %v492_v42 }
  0x81   : > { %v519_v51 = vadd.f32 %v511_v35, %v493_v24  ;;  %v452_v52 = vmul.f32 %v2354_v4, %v451_v22  ;;  %v453_v53 = vmul.f32 %v2359_v5, %v451_v22  ;;  %v533_v55 = vsel %vm345_vm0, %v516_v44, -inf }
  0x82   : > { %v369_v54 = vmax.f32 %v367_v61, %v368_v38  ;;  %v534_v56 = vsel %vm345_vm0, %v517_v48, -inf  ;;  %v454_v58 = vmul.f32 %v2368_v9, %v451_v22  ;;  %v535_v59 = vsel %vm345_vm0, %v518_v50, -inf }
  0x83   : > { %v537_v60 = vsel %vm345_vm0, %v519_v51, -inf  ;;  %v455_v62 = vmul.f32 %v2371_v10, %v451_v22  ;;  %v460_v20 = vadd.f32 %v452_v52, %v434_v23  ;;  %v536_v8 = vmax.f32 %v533_v55, %v535_v59 }
  0x84   : > { %v370_v63 = vrot.slane %v369_v54, 1  ;;  %v538_v42 = vmax.f32 %v534_v56, %v537_v60  ;;  %v461_v24 = vadd.f32 %v453_v53, %v435_v36  ;;  %v462_v61 = vadd.f32 %v454_v58, %v436_v37 }
  0x85   : > { %v463_v12 = vadd.f32 %v455_v62, %v437_v49  ;;  %v478_v15 = vmul.f32 %v2374_v11, %v2505_v32  ;;  %v479_v19 = vmul.f32 %v2381_v16, %v2505_v32  ;;  %v480_v22 = vmul.f32 %v2384_v17, %v2505_v32 }
  0x86   : > { %v2550_v35 = vmax.f32 %v369_v54, %v370_v63  ;;  %v539_v38 = vmax.f32 %v536_v8, %v538_v42  ;;  %v481_v23 = vmul.f32 %v2387_v18, %v2505_v32  ;;  %v504_v44 = vmul.f32 %v2415_v34, %v503_v31 }
  0x87   : > { %v486_v36 = vadd.f32 %v478_v15, %v460_v20  ;;  %v487_v37 = vadd.f32 %v479_v19, %v461_v24  ;;  %v505_v48 = vmul.f32 %v2418_v39, %v503_v31  ;;  %v488_v50 = vadd.f32 %v480_v22, %v462_v61 }
  0x88   : > { %376 = vrot.lane.b32.xlu0 %v2550_v35, %s2179_s7  ;;  %v540_v49 = vrot.slane %v539_v38, 4  ;;  %v489_v51 = vadd.f32 %v481_v23, %v463_v12  ;;  %v506_v52 = vmul.f32 %v2421_v40, %v503_v31  ;;  %v507_v53 = vmul.f32 %v2424_v41, %v503_v31 }
  0x89   : > { %v512_v54 = vadd.f32 %v504_v44, %v486_v36  ;;  %v513_v55 = vadd.f32 %v505_v48, %v487_v37  ;;  %v602_v56 = vstv %s2534_s10  ;;  %v620_v58 = vstv %s2539_s19  ;;  %s2913_s10 = sld [smem:[#allocation5 + $0x302]]  ;;  %s2992_s19 = sld [smem:[#allocation5 + $0x380]] }
  0x8a   : > { %v541_v32 = vmax.f32 %v539_v38, %v540_v49  ;;  %v2565_v59 = vstv %s2541_s8  ;;  %v514_v60 = vadd.f32 %v506_v52, %v488_v50  ;;  %v515_v62 = vadd.f32 %v507_v53, %v489_v51  ;;  %s3000_s8 = sld [smem:[#allocation5 + $0x381]] }
  0x8b   : > { %v520_v20 = vsel %vm345_vm0, %v512_v54, -inf  ;;  %v521_v63 = vsel %vm345_vm0, %v513_v55, -inf  ;;  %v607_v42 = vmul.f32 %v602_v56, %v2362_v6  ;;  %v608_v31 = vmul.f32 %v602_v56, %v2365_v7 }
  0x8c   : > { %v542_v8 = vrot.slane %v541_v32, 2  ;;  %v609_v24 = vmul.f32 %v602_v56, %v2398_v27  ;;  %v522_v61 = vsel %vm345_vm0, %v514_v60, -inf  ;;  %v524_v12 = vsel %vm345_vm0, %v515_v62, -inf }
  0x8d   : > { %v610_v15 = vmul.f32 %v602_v56, %v2401_v28  ;;  %v625_v19 = vmul.f32 %v2404_v29, %v620_v58  ;;  %v523_v22 = vmax.f32 %v520_v20, %v522_v61  ;;  %v525_v23 = vmax.f32 %v521_v63, %v524_v12 }
  0x8e   : > { %v543_v38 = vmax.f32 %v541_v32, %v542_v8  ;;  %v626_v36 = vmul.f32 %v2430_v45, %v620_v58  ;;  %v627_v37 = vmul.f32 %v2433_v46, %v620_v58  ;;  %v628_v44 = vmul.f32 %v2436_v47, %v620_v58 }
  0x8f   : > { %v633_v48 = vadd.f32 %v625_v19, %v607_v42  ;;  %v651_v49 = vmul.f32 %v2444_v57, %v2565_v59  ;;  %v526_v51 = vmax.f32 %v523_v22, %v525_v23  ;;  %v652_v53 = vmul.f32 %v2452_v13, %v2565_v59 }
  0x90   : > { %v544_v50 = vrot.slane %v543_v38, 1  ;;  %v634_v52 = vadd.f32 %v626_v36, %v608_v31  ;;  %v635_v54 = vadd.f32 %v627_v37, %v609_v24  ;;  %v636_v55 = vadd.f32 %v628_v44, %v610_v15 }
  0x91   : > { %v653_v32 = vmul.f32 %v2455_v14, %v2565_v59  ;;  %v654_v60 = vmul.f32 %v2460_v25, %v2565_v59  ;;  %v527_v20 = vrot.slane %v526_v51, 4  ;;  %v659_v63 = vadd.f32 %v651_v49, %v633_v48 }
  0x92   : > { %v2589_v62 = vmax.f32 %v543_v38, %v544_v50  ;;  %v660_v8 = vadd.f32 %v652_v53, %v634_v52  ;;  %v672_v12 = vstv %s2569_s11  ;;  %v603_v19 = vmul.f32 %v602_v56, %v2342_v0  ;;  %s3011_s11 = sld [smem:[#allocation5 + $0x382]] }
  0x93   : > { %v661_v42 = vadd.f32 %v653_v32, %v635_v54  ;;  %v662_v61 = vadd.f32 %v654_v60, %v636_v55  ;;  %v528_v31 = vmax.f32 %v526_v51, %v527_v20  ;;  %v677_v24 = vmul.f32 %v2465_v21, %v672_v12 }
  0x94   : > { %3337 = vst [vmem:[#allocation12_spill] sm:$0xff] %v2589_v62  ;;  %550 = vrot.lane.b32.xlu1 %v2589_v62, %s2179_s7  ;;  %v678_v15 = vmul.f32 %v2468_v26, %v672_v12  ;;  %v679_v22 = vmul.f32 %v2477_v33, %v672_v12  ;;  %v680_v38 = vmul.f32 %v2484_v43, %v672_v12 }
  0x95   : > { %v604_v23 = vmul.f32 %v602_v56, %v2345_v1  ;;  %v605_v36 = vmul.f32 %v602_v56, %v2348_v2  ;;  %v529_v37 = vrot.slane %v528_v31, 2  ;;  %v685_v44 = vadd.f32 %v677_v24, %v659_v63 }
  0x96   : > { %v686_v48 = vadd.f32 %v678_v15, %v660_v8  ;;  %v606_v49 = vmul.f32 %v602_v56, %v2351_v3  ;;  %v687_v50 = vadd.f32 %v679_v22, %v661_v42  ;;  %v688_v51 = vadd.f32 %v680_v38, %v662_v61 }
  0x97   : > { %v621_v52 = vmul.f32 %v2354_v4, %v620_v58  ;;  %v622_v53 = vmul.f32 %v2359_v5, %v620_v58  ;;  %v530_v54 = vmax.f32 %v528_v31, %v529_v37  ;;  %v702_v55 = vsel %vm345_vm0, %v685_v44, -inf }
  0x98   : > { %v703_v32 = vsel %vm345_vm0, %v686_v48, -inf  ;;  %v623_v60 = vmul.f32 %v2368_v9, %v620_v58  ;;  %v704_v20 = vsel %vm345_vm0, %v687_v50, -inf  ;;  %v706_v63 = vsel %vm345_vm0, %v688_v51, -inf }
  0x99   : > { %v624_v56 = vmul.f32 %v2371_v10, %v620_v58  ;;  %v629_v8 = vadd.f32 %v621_v52, %v603_v19  ;;  %v531_v42 = vrot.slane %v530_v54, 1  ;;  %v705_v61 = vmax.f32 %v702_v55, %v704_v20 }
  0x9a   : > { %v707_v24 = vmax.f32 %v703_v32, %v706_v63  ;;  %v630_v15 = vadd.f32 %v622_v53, %v604_v23  ;;  %v631_v31 = vadd.f32 %v623_v60, %v605_v36  ;;  %v647_v38 = vmul.f32 %v2374_v11, %v2565_v59 }
  0x9b   : > { %v632_v22 = vadd.f32 %v624_v56, %v606_v49  ;;  %v648_v37 = vmul.f32 %v2381_v16, %v2565_v59  ;;  %v2618_v44 = vmax.f32 %v530_v54, %v531_v42  ;;  %v649_v58 = vmul.f32 %v2384_v17, %v2565_v59 }
  0x9c   : > { %v708_v48 = vmax.f32 %v705_v61, %v707_v24  ;;  %v650_v19 = vmul.f32 %v2387_v18, %v2565_v59  ;;  %v655_v23 = vadd.f32 %v647_v38, %v629_v8  ;;  %v673_v36 = vmul.f32 %v2415_v34, %v672_v12 }
  0x9d   : > { %3338 = vst [vmem:[#allocation13_spill] sm:$0xff] %v2618_v44  ;;  %v656_v50 = vadd.f32 %v648_v37, %v630_v15  ;;  %v674_v49 = vmul.f32 %v2418_v39, %v672_v12  ;;  %548 = vrot.lane.b32.xlu0 %v2618_v44, %s2179_s7  ;;  %v657_v52 = vadd.f32 %v649_v58, %v631_v31  ;;  %v771_v60 = vstv %s2604_s12  ;;  %s3025_s12 = sld [smem:[#allocation5 + $0x383]] }
  0x9e   : > { %v709_v51 = vrot.slane %v708_v48, 4  ;;  %v658_v53 = vadd.f32 %v650_v19, %v632_v22  ;;  %v675_v54 = vmul.f32 %v2421_v40, %v672_v12  ;;  %v676_v59 = vmul.f32 %v2424_v41, %v672_v12 }
  0x9f   : > { %v681_v55 = vadd.f32 %v673_v36, %v655_v23  ;;  %v682_v32 = vadd.f32 %v674_v49, %v656_v50  ;;  %v776_v56 = vmul.f32 %v771_v60, %v2362_v6  ;;  %v777_v8 = vmul.f32 %v771_v60, %v2365_v7 }
  0xa0   : > { %v710_v20 = vmax.f32 %v708_v48, %v709_v51  ;;  %v683_v63 = vadd.f32 %v675_v54, %v657_v52  ;;  %v684_v42 = vadd.f32 %v676_v59, %v658_v53  ;;  %v778_v15 = vmul.f32 %v771_v60, %v2398_v27 }
  0xa1   : > { %v689_v61 = vsel %vm345_vm0, %v681_v55, -inf  ;;  %v690_v24 = vsel %vm345_vm0, %v682_v32, -inf  ;;  %v779_v22 = vmul.f32 %v771_v60, %v2401_v28  ;;  %v789_v38 = vstv %s2612_s18  ;;  %s1794_s18 = sld [smem:[#allocation6 + $0x1]] }
  0xa2   : > { %v711_v31 = vrot.slane %v710_v20, 2  ;;  %v691_v12 = vsel %vm345_vm0, %v683_v63, -inf  ;;  %v693_v48 = vsel %vm345_vm0, %v684_v42, -inf  ;;  %v794_v58 = vmul.f32 %v2404_v29, %v789_v38 }
  0xa3   : > { %v692_v37 = vmax.f32 %v689_v61, %v691_v12  ;;  %v795_v19 = vmul.f32 %v2430_v45, %v789_v38  ;;  %v694_v50 = vmax.f32 %v690_v24, %v693_v48  ;;  %v796_v36 = vmul.f32 %v2433_v46, %v789_v38 }
  0xa4   : > { %v712_v23 = vmax.f32 %v710_v20, %v711_v31  ;;  %v797_v49 = vmul.f32 %v2436_v47, %v789_v38  ;;  %v802_v51 = vadd.f32 %v794_v58, %v776_v56  ;;  %v815_v53 = vstv %s2626_s23  ;;  %s1972_s23 = sshll.u32 %s3362_s15, 4  ;;  %s1852_s15 = sld [smem:[#allocation6 + $0x3]] }
  0xa5   : > { %v803_v52 = vadd.f32 %v795_v19, %v777_v8  ;;  %v2650_v54 = vstv %s2628_s26  ;;  %v695_v55 = vmax.f32 %v692_v37, %v694_v50  ;;  %v804_v32 = vadd.f32 %v796_v36, %v778_v15 }
  0xa6   : > { %v713_v59 = vrot.slane %v712_v23, 1  ;;  %v805_v63 = vadd.f32 %v797_v49, %v779_v22  ;;  %v820_v42 = vmul.f32 %v2444_v57, %v815_v53  ;;  %v821_v61 = vmul.f32 %v2452_v13, %v815_v53 }
  0xa7   : > { %v822_v20 = vmul.f32 %v2455_v14, %v815_v53  ;;  %v823_v24 = vmul.f32 %v2460_v25, %v815_v53  ;;  %v696_v12 = vrot.slane %v695_v55, 4  ;;  %v846_v56 = vmul.f32 %v2465_v21, %v2650_v54 }
  0xa8   : > { %v2656_v31 = vmax.f32 %v712_v23, %v713_v59  ;;  %v847_v8 = vmul.f32 %v2468_v26, %v2650_v54  ;;  %v828_v37 = vadd.f32 %v820_v42, %v802_v51  ;;  %v829_v15 = vadd.f32 %v821_v61, %v803_v52 }
  0xa9   : > { %v830_v22 = vadd.f32 %v822_v20, %v804_v32  ;;  %v831_v48 = vadd.f32 %v823_v24, %v805_v63  ;;  %v697_v58 = vmax.f32 %v695_v55, %v696_v12  ;;  %v848_v19 = vmul.f32 %v2477_v33, %v2650_v54 }
  0xaa   : > { %3339 = vst [vmem:[#allocation14_spill] sm:$0xff] %v2656_v31  ;;  %719 = vrot.lane.b32.xlu1 %v2656_v31, %s2179_s7  ;;  %v849_v23 = vmul.f32 %v2484_v43, %v2650_v54  ;;  %v854_v50 = vadd.f32 %v846_v56, %v828_v37  ;;  %v855_v36 = vadd.f32 %v847_v8, %v829_v15  ;;  %v2958_v31 = vstv %s2913_s10 }
  0xab   : > { %v772_v49 = vmul.f32 %v771_v60, %v2342_v0  ;;  %v773_v59 = vmul.f32 %v771_v60, %v2345_v1  ;;  %v698_v51 = vrot.slane %v697_v58, 2  ;;  %v856_v52 = vadd.f32 %v848_v19, %v830_v22 }
  0xac   : > { %v857_v32 = vadd.f32 %v849_v23, %v831_v48  ;;  %v774_v63 = vmul.f32 %v771_v60, %v2348_v2  ;;  %v871_v42 = vsel %vm345_vm0, %v854_v50, -inf  ;;  %v872_v55 = vsel %vm345_vm0, %v855_v36, -inf }
  0xad   : > { %v775_v61 = vmul.f32 %v771_v60, %v2351_v3  ;;  %v790_v20 = vmul.f32 %v2354_v4, %v789_v38  ;;  %v699_v24 = vmax.f32 %v697_v58, %v698_v51  ;;  %v873_v0 = vsel %vm345_vm0, %v856_v52, -inf }
  0xae   : > { %v875_v1 = vsel %vm345_vm0, %v857_v32, -inf  ;;  %v791_v12 = vmul.f32 %v2359_v5, %v789_v38  ;;  %v874_v56 = vmax.f32 %v871_v42, %v873_v0  ;;  %v792_v2 = vmul.f32 %v2368_v9, %v789_v38 }
  0xaf   : > { %v876_v8 = vmax.f32 %v872_v55, %v875_v1  ;;  %v793_v37 = vmul.f32 %v2371_v10, %v789_v38  ;;  %v700_v15 = vrot.slane %v699_v24, 1  ;;  %v798_v22 = vadd.f32 %v790_v20, %v772_v49 }
  0xb0   : > { %v799_v3 = vadd.f32 %v791_v12, %v773_v59  ;;  %v816_v4 = vmul.f32 %v2374_v11, %v815_v53  ;;  %v800_v48 = vadd.f32 %v792_v2, %v774_v63  ;;  %v817_v19 = vmul.f32 %v2381_v16, %v815_v53 }
  0xb1   : > { %v877_v60 = vmax.f32 %v874_v56, %v876_v8  ;;  %v801_v58 = vadd.f32 %v793_v37, %v775_v61  ;;  %v2686_v23 = vmax.f32 %v699_v24, %v700_v15  ;;  %v818_v5 = vmul.f32 %v2384_v17, %v815_v53 }
  0xb2   : > { %v819_v9 = vmul.f32 %v2387_v18, %v815_v53  ;;  %v824_v10 = vadd.f32 %v816_v4, %v798_v22  ;;  %v825_v50 = vadd.f32 %v817_v19, %v799_v3  ;;  %v842_v11 = vmul.f32 %v2415_v34, %v2650_v54  ;;  %v2732_v3 = vld [vmem:[%s2327_s5] sm:$0xff] }
  0xb3   : > { %3340 = vst [vmem:[#allocation15_spill] sm:$0xff] %v2686_v23  ;;  %v878_v38 = vrot.slane %v877_v60, 4  ;;  %v843_v36 = vmul.f32 %v2418_v39, %v2650_v54  ;;  %717 = vrot.lane.b32.xlu0 %v2686_v23, %s2179_s7  ;;  %v826_v16 = vadd.f32 %v818_v5, %v800_v48  ;;  %v844_v17 = vmul.f32 %v2421_v40, %v2650_v54  ;;  %v2744_v5 = vld [vmem:[%s2327_s5 + $0x8] sm:$0xff] }
  0xb4   : > { %v827_v49 = vadd.f32 %v819_v9, %v801_v58  ;;  %v845_v18 = vmul.f32 %v2424_v41, %v2650_v54  ;;  %v850_v59 = vadd.f32 %v842_v11, %v824_v10  ;;  %v940_v52 = vstv %s2675_s29  ;;  %v2750_v9 = vld [vmem:[%s2327_s5 + $0x18] sm:$0xff] }
  0xb5   : > { %v879_v53 = vmax.f32 %v877_v60, %v878_v38  ;;  %v851_v51 = vadd.f32 %v843_v36, %v825_v50  ;;  %v852_v34 = vadd.f32 %v844_v17, %v826_v16  ;;  %v945_v39 = vmul.f32 %v940_v52, %v2362_v6  ;;  %v2767_v17 = vld [vmem:[%s2327_s5 + $0x48] sm:$0xff] }
  0xb6   : > { %v853_v32 = vadd.f32 %v845_v18, %v827_v49  ;;  %v946_v63 = vmul.f32 %v940_v52, %v2365_v7  ;;  %v858_v40 = vsel %vm345_vm0, %v850_v59, -inf  ;;  %v947_v41 = vmul.f32 %v940_v52, %v2398_v27  ;;  %v2764_v49 = vld [vmem:[%s2327_s5 + $0x40] sm:$0xff]  ;;  %v2770_v18 = vld [vmem:[%s2327_s5 + $0x50] sm:$0xff] }
  0xb7   : > { %v880_v42 = vrot.slane %v879_v53, 2  ;;  %v859_v55 = vsel %vm345_vm0, %v851_v51, -inf  ;;  %v860_v54 = vsel %vm345_vm0, %v852_v34, -inf  ;;  %v948_v20 = vmul.f32 %v940_v52, %v2401_v28 }
  0xb8   : > { %v862_v61 = vsel %vm345_vm0, %v853_v32, -inf  ;;  %v2714_v24 = vstv %s2683_s4  ;;  %v861_v7 = vmax.f32 %v858_v40, %v860_v54  ;;  %v2725_v8 = vstv %s2690_s25  ;;  %v2785_v40 = vld [vmem:[%s2327_s5 + $0x80] sm:$0xff]  ;;  %s3241_s4 = scalar_lea.vmem %s3312_s3, %s1972_s23  ;;  %s1823_s25 = sld [smem:[#allocation6 + $0x2]] }
  0xb9   : > { %v881_v6 = vmax.f32 %v879_v53, %v880_v42  ;;  %v863_v0 = vmax.f32 %v859_v55, %v862_v61  ;;  %v963_v1 = vmul.f32 %v2404_v29, %v2714_v24  ;;  %v964_v12 = vmul.f32 %v2430_v45, %v2714_v24 }
  0xba   : > { %v965_v27 = vmul.f32 %v2433_v46, %v2714_v24  ;;  %v966_v56 = vmul.f32 %v2436_v47, %v2714_v24  ;;  %v989_v29 = vmul.f32 %v2444_v57, %v2725_v8  ;;  %v990_v46 = vmul.f32 %v2452_v13, %v2725_v8  ;;  %v2747_v13 = vld [vmem:[%s2327_s5 + $0x10] sm:$0xff] }
  0xbb   : > { %v882_v28 = vrot.slane %v881_v6, 1  ;;  %v864_v2 = vmax.f32 %v861_v7, %v863_v0  ;;  %v971_v37 = vadd.f32 %v963_v1, %v945_v39  ;;  %v972_v15 = vadd.f32 %v964_v12, %v946_v63  ;;  %v2801_v12 = vld [vmem:[%s2327_s5 + $0x90] sm:$0xff] }
  0xbc   : > { %v973_v45 = vadd.f32 %v965_v27, %v947_v41  ;;  %v974_v22 = vadd.f32 %v966_v56, %v948_v20  ;;  %v991_v60 = vmul.f32 %v2455_v14, %v2725_v8  ;;  %v992_v48 = vmul.f32 %v2460_v25, %v2725_v8  ;;  %v2796_v20 = vld [vmem:[%s2327_s5 + $0x88] sm:$0xff]  ;;  %v2804_v27 = vld [vmem:[%s2327_s5 + $0x98] sm:$0xff]  ;;  %v2807_v56 = vld [vmem:[%s2327_s5 + $0xc0] sm:$0xff] }
  0xbd   : > { %v2734_v47 = vmax.f32 %v881_v6, %v882_v28  ;;  %v865_v4 = vrot.slane %v864_v2, 4  ;;  %v997_v58 = vadd.f32 %v989_v29, %v971_v37  ;;  %v998_v57 = vadd.f32 %v990_v46, %v972_v15  ;;  %v2812_v15 = vld [vmem:[%s2327_s5 + $0xc8] sm:$0xff] }
  0xbe   : > { %v2741_v19 = vstv %s2705_s21  ;;  %v999_v10 = vadd.f32 %v991_v60, %v973_v45  ;;  %v1000_v38 = vadd.f32 %v992_v48, %v974_v22  ;;  %v941_v25 = vmul.f32 %v940_v52, %v2732_v3  ;;  %v2815_v45 = vld [vmem:[%s2327_s5 + $0xd0] sm:$0xff]  ;;  %v2822_v60 = vld [vmem:[%s2327_s5 + $0xd8] sm:$0xff]  ;;  %s1881_s21 = sld [smem:[#allocation6 + $0x4]] }
  0xbf   : > { %3341 = vst [vmem:[#allocation16_spill] sm:$0xff] %v2734_v47  ;;  %888 = vrot.lane.b32.xlu1 %v2734_v47, %s2179_s7  ;;  %v866_v14 = vmax.f32 %v864_v2, %v865_v4  ;;  %v1015_v50 = vmul.f32 %v2465_v21, %v2741_v19  ;;  %v1016_v11 = vmul.f32 %v2468_v26, %v2741_v19  ;;  %v1296_v23 = vstv %s2911_s6 }
  0xc0   : > { %v1017_v36 = vmul.f32 %v2477_v33, %v2741_v19  ;;  %v1018_v16 = vmul.f32 %v2484_v43, %v2741_v19  ;;  %v942_v59 = vmul.f32 %v940_v52, %v2744_v5  ;;  %v943_v21 = vmul.f32 %v940_v52, %v2747_v13  ;;  %v2776_v43 = vld [vmem:[%s2327_s5 + $0x58] sm:$0xff] }
  0xc1   : > { %v867_v53 = vrot.slane %v866_v14, 2  ;;  %v944_v26 = vmul.f32 %v940_v52, %v2750_v9  ;;  %v1023_v51 = vadd.f32 %v1015_v50, %v997_v58  ;;  %v1024_v33 = vadd.f32 %v1016_v11, %v998_v57  ;;  %v2839_v50 = vld [vmem:[%s2327_s5 + $0x20] sm:$0xff] }
  0xc2   : > { %v1025_v34 = vadd.f32 %v1017_v36, %v999_v10  ;;  %v1026_v32 = vadd.f32 %v1018_v16, %v1000_v38  ;;  %v959_v63 = vmul.f32 %v2764_v49, %v2714_v24  ;;  %v960_v42 = vmul.f32 %v2767_v17, %v2714_v24 }
  0xc3   : > { %v868_v39 = vmax.f32 %v866_v14, %v867_v53  ;;  %v961_v52 = vmul.f32 %v2770_v18, %v2714_v24  ;;  %v1040_v55 = vsel %vm345_vm0, %v1023_v51, -inf  ;;  %v1041_v41 = vsel %vm345_vm0, %v1024_v33, -inf  ;;  %v2850_v33 = vld [vmem:[%s2327_s5 + $0x38] sm:$0xff] }
  0xc4   : > { %v1042_v54 = vsel %vm345_vm0, %v1025_v34, -inf  ;;  %v1044_v61 = vsel %vm345_vm0, %v1026_v32, -inf  ;;  %v962_v1 = vmul.f32 %v2776_v43, %v2714_v24  ;;  %v967_v28 = vadd.f32 %v959_v63, %v941_v25  ;;  %v2856_v32 = vld [vmem:[%s2327_s5 + $0x60] sm:$0xff] }
  0xc5   : > { %v869_v6 = vrot.slane %v868_v39, 1  ;;  %v1043_v7 = vmax.f32 %v1040_v55, %v1042_v54  ;;  %v1045_v0 = vmax.f32 %v1041_v41, %v1044_v61  ;;  %v968_v2 = vadd.f32 %v960_v42, %v942_v59  ;;  %v2844_v59 = vld [vmem:[%s2327_s5 + $0x28] sm:$0xff] }
  0xc6   : > { %v969_v37 = vadd.f32 %v961_v52, %v943_v21  ;;  %v985_v29 = vmul.f32 %v2785_v40, %v2725_v8  ;;  %v970_v46 = vadd.f32 %v962_v1, %v944_v26  ;;  %v986_v4 = vmul.f32 %v2796_v20, %v2725_v8  ;;  %v2847_v21 = vld [vmem:[%s2327_s5 + $0x30] sm:$0xff]  ;;  %v2865_v55 = vld [vmem:[%s2327_s5 + $0x68] sm:$0xff] }
  0xc7   : > { %v2817_v22 = vmax.f32 %v868_v39, %v869_v6  ;;  %v1046_v24 = vmax.f32 %v1043_v7, %v1045_v0  ;;  %v987_v48 = vmul.f32 %v2801_v12, %v2725_v8  ;;  %v988_v58 = vmul.f32 %v2804_v27, %v2725_v8  ;;  %v2877_v7 = vld [vmem:[%s2327_s5 + $0x70] sm:$0xff]  ;;  %v2880_v0 = vld [vmem:[%s2327_s5 + $0x78] sm:$0xff] }
  0xc8   : > { %v993_v57 = vadd.f32 %v985_v29, %v967_v28  ;;  %v1011_v14 = vmul.f32 %v2807_v56, %v2741_v19  ;;  %v994_v38 = vadd.f32 %v986_v4, %v968_v2  ;;  %v1012_v25 = vmul.f32 %v2812_v15, %v2741_v19  ;;  %v2889_v29 = vld [vmem:[%s2327_s5 + $0xa0] sm:$0xff] }
  0xc9   : > { %3342 = vst [vmem:[#allocation17_spill] sm:$0xff] %v2817_v22  ;;  %886 = vrot.lane.b32.xlu0 %v2817_v22, %s2179_s7  ;;  %v1047_v10 = vrot.slane %v1046_v24, 4  ;;  %v1013_v8 = vmul.f32 %v2815_v45, %v2741_v19  ;;  %v995_v11 = vadd.f32 %v987_v48, %v969_v37  ;;  %v996_v36 = vadd.f32 %v988_v58, %v970_v46  ;;  %v2894_v58 = vld [vmem:[%s2327_s5 + $0xa8] sm:$0xff] }
  0xca   : > { %v1014_v16 = vmul.f32 %v2822_v60, %v2741_v19  ;;  %v1019_v53 = vadd.f32 %v1011_v14, %v993_v57  ;;  %v1020_v51 = vadd.f32 %v1012_v25, %v994_v38  ;;  %v2853_v34 = vstv %s2787_s30  ;;  %v2897_v57 = vld [vmem:[%s2327_s5 + $0xb0] sm:$0xff]  ;;  %v2904_v25 = vld [vmem:[%s2327_s5 + $0xb8] sm:$0xff]  ;;  %s1910_s30 = sld [smem:[#allocation6 + $0x5]] }
  0xcb   : > { %v1048_v26 = vmax.f32 %v1046_v24, %v1047_v10  ;;  %v2859_v39 = vstv %s2789_s20  ;;  %v1021_v63 = vadd.f32 %v1013_v8, %v995_v11  ;;  %v1114_v52 = vmul.f32 %v2853_v34, %v2839_v50  ;;  %s1939_s20 = sld [smem:[#allocation6 + $0x6]] }
  0xcc   : > { %v1022_v42 = vadd.f32 %v1014_v16, %v996_v36  ;;  %v1027_v19 = vsel %vm345_vm0, %v1019_v53, -inf  ;;  %v1028_v54 = vsel %vm345_vm0, %v1020_v51, -inf  ;;  %v1115_v61 = vmul.f32 %v2853_v34, %v2844_v59 }
  0xcd   : > { %v1049_v41 = vrot.slane %v1048_v26, 2  ;;  %v1116_v6 = vmul.f32 %v2853_v34, %v2847_v21  ;;  %v1029_v1 = vsel %vm345_vm0, %v1021_v63, -inf  ;;  %v1117_v2 = vmul.f32 %v2853_v34, %v2850_v33 }
  0xce   : > { %v1031_v28 = vsel %vm345_vm0, %v1022_v42, -inf  ;;  %v1132_v37 = vmul.f32 %v2856_v32, %v2859_v39  ;;  %v1030_v46 = vmax.f32 %v1027_v19, %v1029_v1  ;;  %v1133_v48 = vmul.f32 %v2865_v55, %v2859_v39  ;;  %v2920_v19 = vld [vmem:[%s2327_s5 + $0xe0] sm:$0xff]  ;;  %v2927_v1 = vld [vmem:[%s2327_s5 + $0xe8] sm:$0xff] }
  0xcf   : > { %v1050_v24 = vmax.f32 %v1048_v26, %v1049_v41  ;;  %v1032_v4 = vmax.f32 %v1028_v54, %v1031_v28  ;;  %v1134_v14 = vmul.f32 %v2877_v7, %v2859_v39  ;;  %v1135_v10 = vmul.f32 %v2880_v0, %v2859_v39  ;;  %v2930_v28 = vld [vmem:[%s2327_s5 + $0xf0] sm:$0xff] }
  0xd0   : > { %v1140_v38 = vadd.f32 %v1132_v37, %v1114_v52  ;;  %v2907_v8 = vstv %s2830_s22  ;;  %v1141_v16 = vadd.f32 %v1133_v48, %v1115_v61  ;;  %v1301_v62 = vmul.f32 %v2856_v32, %v1296_v23  ;;  %s1968_s22 = sld [smem:[#allocation6 + $0x7]] }
  0xd1   : > { %v1051_v11 = vrot.slane %v1050_v24, 1  ;;  %v1033_v36 = vmax.f32 %v1030_v46, %v1032_v4  ;;  %v1158_v53 = vmul.f32 %v2889_v29, %v2907_v8  ;;  %v1142_v26 = vadd.f32 %v1134_v14, %v1116_v6  ;;  %v2933_v6 = vld [vmem:[%s2327_s5 + $0xf8] sm:$0xff]  ;;  %s2952_s5 = sld [smem:[#allocation5 + $0x303]] }
  0xd2   : > { %v1143_v51 = vadd.f32 %v1135_v10, %v1117_v2  ;;  %v1159_v63 = vmul.f32 %v2894_v58, %v2907_v8  ;;  %v1160_v42 = vmul.f32 %v2897_v57, %v2907_v8  ;;  %v1161_v54 = vmul.f32 %v2904_v25, %v2907_v8 }
  0xd3   : > { %v2922_v52 = vmax.f32 %v1050_v24, %v1051_v11  ;;  %v1034_v41 = vrot.slane %v1033_v36, 4  ;;  %v1166_v61 = vadd.f32 %v1158_v53, %v1140_v38  ;;  %v2936_v46 = vstv %s2867_s24 }
  0xd4   : > { %v1167_v2 = vadd.f32 %v1159_v63, %v1141_v16  ;;  %v1168_v37 = vadd.f32 %v1160_v42, %v1142_v26  ;;  %v1278_v4 = vstv %s2869_s28  ;;  %v1169_v48 = vadd.f32 %v1161_v54, %v1143_v51 }
  0xd5   : > { %3343 = vst [vmem:[#allocation18_spill] sm:$0xff] %v2922_v52  ;;  %1057 = vrot.lane.b32.xlu0 %v2922_v52, %s2179_s7  ;;  %v1035_v24 = vmax.f32 %v1033_v36, %v1034_v41  ;;  %v1184_v14 = vmul.f32 %v2920_v19, %v2936_v46  ;;  %v1185_v10 = vmul.f32 %v2927_v1, %v2936_v46 }
  0xd6   : > { %v1186_v38 = vmul.f32 %v2930_v28, %v2936_v46  ;;  %v1187_v11 = vmul.f32 %v2933_v6, %v2936_v46  ;;  %v1283_v16 = vmul.f32 %v1278_v4, %v2839_v50  ;;  %v1284_v36 = vmul.f32 %v1278_v4, %v2844_v59 }
  0xd7   : > { %v1036_v53 = vrot.slane %v1035_v24, 2  ;;  %v1192_v26 = vadd.f32 %v1184_v14, %v1166_v61  ;;  %v1285_v51 = vmul.f32 %v1278_v4, %v2847_v21  ;;  %v1193_v63 = vadd.f32 %v1185_v10, %v1167_v2 }
  0xd8   : > { %v1194_v42 = vadd.f32 %v1186_v38, %v1168_v37  ;;  %v1195_v41 = vadd.f32 %v1187_v11, %v1169_v48  ;;  %v1286_v54 = vmul.f32 %v1278_v4, %v2850_v33  ;;  %v1302_v48 = vmul.f32 %v2865_v55, %v1296_v23 }
  0xd9   : > { %v1037_v22 = vmax.f32 %v1035_v24, %v1036_v53  ;;  %v1209_v47 = vsel %vm345_vm0, %v1192_v26, -inf  ;;  %v1210_v44 = vsel %vm345_vm0, %v1193_v63, -inf  ;;  %v1303_v24 = vmul.f32 %v2877_v7, %v1296_v23 }
  0xda   : > { %v1211_v61 = vsel %vm345_vm0, %v1194_v42, -inf  ;;  %v1213_v14 = vsel %vm345_vm0, %v1195_v41, -inf  ;;  %v1304_v10 = vmul.f32 %v2880_v0, %v1296_v23  ;;  %v1309_v38 = vadd.f32 %v1301_v62, %v1283_v16 }
  0xdb   : > { %v1038_v30 = vrot.slane %v1037_v22, 1  ;;  %v1212_v2 = vmax.f32 %v1209_v47, %v1211_v61  ;;  %v1214_v37 = vmax.f32 %v1210_v44, %v1213_v14  ;;  %v1327_v11 = vmul.f32 %v2889_v29, %v2958_v31 }
  0xdc   : > { %v1310_v63 = vadd.f32 %v1302_v48, %v1284_v36  ;;  %v1328_v42 = vmul.f32 %v2894_v58, %v2958_v31  ;;  %v1311_v47 = vadd.f32 %v1303_v24, %v1285_v51  ;;  %v1312_v44 = vadd.f32 %v1304_v10, %v1286_v54 }
  0xdd   : > { %v2969_v53 = vmax.f32 %v1037_v22, %v1038_v30  ;;  %v1215_v26 = vmax.f32 %v1212_v2, %v1214_v37  ;;  %v1329_v41 = vmul.f32 %v2897_v57, %v2958_v31  ;;  %v1330_v61 = vmul.f32 %v2904_v25, %v2958_v31 }
  0xde   : > { %v1335_v16 = vadd.f32 %v1327_v11, %v1309_v38  ;;  %v1336_v30 = vadd.f32 %v1328_v42, %v1310_v63  ;;  %v1348_v22 = vstv %s2952_s5  ;;  %v1279_v24 = vmul.f32 %v1278_v4, %v2732_v3 }
  0xdf   : > { %3344 = vst [vmem:[#allocation19_spill] sm:$0xff] %v2969_v53  ;;  %1055 = vrot.lane.b32.xlu1 %v2969_v53, %s2179_s7  ;;  %v1216_v62 = vrot.slane %v1215_v26, 4  ;;  %v1337_v14 = vadd.f32 %v1329_v41, %v1311_v47  ;;  %v1338_v36 = vadd.f32 %v1330_v61, %v1312_v44  ;;  %v1353_v2 = vmul.f32 %v2920_v19, %v1348_v22 }
  0xe0   : > { %v1354_v51 = vmul.f32 %v2927_v1, %v1348_v22  ;;  %v1355_v37 = vmul.f32 %v2930_v28, %v1348_v22  ;;  %v1356_v48 = vmul.f32 %v2933_v6, %v1348_v22  ;;  %v1280_v53 = vmul.f32 %v1278_v4, %v2744_v5 }
  0xe1   : > { %v1217_v54 = vmax.f32 %v1215_v26, %v1216_v62  ;;  %v1361_v10 = vadd.f32 %v1353_v2, %v1335_v16  ;;  %v1281_v38 = vmul.f32 %v1278_v4, %v2747_v13  ;;  %v1282_v47 = vmul.f32 %v1278_v4, %v2750_v9 }
  0xe2   : > { %v1362_v52 = vadd.f32 %v1354_v51, %v1336_v30  ;;  %v1363_v63 = vadd.f32 %v1355_v37, %v1337_v14  ;;  %v1364_v42 = vadd.f32 %v1356_v48, %v1338_v36  ;;  %v1297_v41 = vmul.f32 %v2764_v49, %v1296_v23 }
  0xe3   : > { %v1218_v11 = vrot.slane %v1217_v54, 2  ;;  %v1378_v44 = vsel %vm345_vm0, %v1361_v10, -inf  ;;  %v1298_v61 = vmul.f32 %v2767_v17, %v1296_v23  ;;  %v1299_v14 = vmul.f32 %v2770_v18, %v1296_v23 }
  0xe4   : > { %v1379_v26 = vsel %vm345_vm0, %v1362_v52, -inf  ;;  %v1380_v16 = vsel %vm345_vm0, %v1363_v63, -inf  ;;  %v1382_v30 = vsel %vm345_vm0, %v1364_v42, -inf  ;;  %v1300_v4 = vmul.f32 %v2776_v43, %v1296_v23 }
  0xe5   : > { %v1219_v62 = vmax.f32 %v1217_v54, %v1218_v11  ;;  %v1381_v36 = vmax.f32 %v1378_v44, %v1380_v16  ;;  %v1383_v2 = vmax.f32 %v1379_v26, %v1382_v30  ;;  %v1305_v51 = vadd.f32 %v1297_v41, %v1279_v24 }
  0xe6   : > { %v1306_v52 = vadd.f32 %v1298_v61, %v1280_v53  ;;  %v1307_v48 = vadd.f32 %v1299_v14, %v1281_v38  ;;  %v1323_v10 = vmul.f32 %v2785_v40, %v2958_v31  ;;  %v1308_v11 = vadd.f32 %v1300_v4, %v1282_v47 }
  0xe7   : > { %v1220_v37 = vrot.slane %v1219_v62, 1  ;;  %v1384_v54 = vmax.f32 %v1381_v36, %v1383_v2  ;;  %v1324_v63 = vmul.f32 %v2796_v20, %v2958_v31  ;;  %v1325_v42 = vmul.f32 %v2801_v12, %v2958_v31 }
  0xe8   : > { %v1326_v23 = vmul.f32 %v2804_v27, %v2958_v31  ;;  %v1331_v53 = vadd.f32 %v1323_v10, %v1305_v51  ;;  %v1349_v24 = vmul.f32 %v2807_v56, %v1348_v22  ;;  %v1350_v41 = vmul.f32 %v2812_v15, %v1348_v22 }
  0xe9   : > { %v3006_v44 = vmax.f32 %v1219_v62, %v1220_v37  ;;  %v1385_v38 = vrot.slane %v1384_v54, 4  ;;  %v1332_v26 = vadd.f32 %v1324_v63, %v1306_v52  ;;  %v1333_v47 = vadd.f32 %v1325_v42, %v1307_v48 }
  0xea   : > { %v1334_v61 = vadd.f32 %v1326_v23, %v1308_v11  ;;  %v1351_v62 = vmul.f32 %v2815_v45, %v1348_v22  ;;  %v1352_v16 = vmul.f32 %v2822_v60, %v1348_v22  ;;  %v1357_v31 = vadd.f32 %v1349_v24, %v1331_v53 }
  0xeb   : > { %1226 = vrot.lane.b32.xlu0 %v3006_v44, %s2179_s7  ;;  %v1386_v30 = vmax.f32 %v1384_v54, %v1385_v38  ;;  %v1358_v14 = vadd.f32 %v1350_v41, %v1332_v26  ;;  %v3019_v36 = vstv %s2992_s19  ;;  %v3036_v63 = vstv %s3000_s8 }
  0xec   : > { %v1359_v2 = vadd.f32 %v1351_v62, %v1333_v47  ;;  %v1360_v4 = vadd.f32 %v1352_v16, %v1334_v61  ;;  %v1452_v51 = vmul.f32 %v3019_v36, %v2839_v50  ;;  %v1453_v37 = vmul.f32 %v3019_v36, %v2844_v59 }
  0xed   : > { %v1387_v52 = vrot.slane %v1386_v30, 2  ;;  %v1365_v22 = vsel %vm345_vm0, %v1357_v31, -inf  ;;  %v1366_v48 = vsel %vm345_vm0, %v1358_v14, -inf  ;;  %v1454_v10 = vmul.f32 %v3019_v36, %v2847_v21 }
  0xee   : > { %v1367_v54 = vsel %vm345_vm0, %v1359_v2, -inf  ;;  %v1369_v11 = vsel %vm345_vm0, %v1360_v4, -inf  ;;  %v1455_v50 = vmul.f32 %v3019_v36, %v2850_v33  ;;  %v1470_v53 = vmul.f32 %v2856_v32, %v3036_v63 }
  0xef   : > { %v1388_v59 = vmax.f32 %v1386_v30, %v1387_v52  ;;  %v1368_v42 = vmax.f32 %v1365_v22, %v1367_v54  ;;  %v1370_v23 = vmax.f32 %v1366_v48, %v1369_v11  ;;  %v1471_v24 = vmul.f32 %v2865_v55, %v3036_v63 }
  0xf0   : > { %v1472_v21 = vmul.f32 %v2877_v7, %v3036_v63  ;;  %v1473_v38 = vmul.f32 %v2880_v0, %v3036_v63  ;;  %v3047_v26 = vstv %s3011_s11  ;;  %v1478_v41 = vadd.f32 %v1470_v53, %v1452_v51 }
  0xf1   : > { %v1389_v33 = vrot.slane %v1388_v59, 1  ;;  %v1371_v47 = vmax.f32 %v1368_v42, %v1370_v23  ;;  %v1496_v61 = vmul.f32 %v2889_v29, %v3047_v26  ;;  %v1479_v62 = vadd.f32 %v1471_v24, %v1453_v37 }
  0xf2   : > { %v1480_v32 = vadd.f32 %v1472_v21, %v1454_v10  ;;  %v1481_v16 = vadd.f32 %v1473_v38, %v1455_v50  ;;  %v1497_v55 = vmul.f32 %v2894_v58, %v3047_v26  ;;  %v1498_v0 = vmul.f32 %v2897_v57, %v3047_v26 }
  0xf3   : > { %v3053_v30 = vmax.f32 %v1388_v59, %v1389_v33  ;;  %v1372_v7 = vrot.slane %v1371_v47, 4  ;;  %v1499_v31 = vmul.f32 %v2904_v25, %v3047_v26  ;;  %v1504_v14 = vadd.f32 %v1496_v61, %v1478_v41 }
  0xf4   : > { %v1505_v2 = vadd.f32 %v1497_v55, %v1479_v62  ;;  %v3060_v4 = vstv %s3025_s12  ;;  %v1506_v51 = vadd.f32 %v1498_v0, %v1480_v32  ;;  %v1110_v58 = vmul.f32 %v2853_v34, %v2732_v3 }
  0xf5   : > { %1395 = vrot.lane.b32.xlu0 %v3053_v30, %s2179_s7  ;;  %v1373_v29 = vmax.f32 %v1371_v47, %v1372_v7  ;;  %v1507_v37 = vadd.f32 %v1499_v31, %v1481_v16  ;;  %v1522_v52 = vmul.f32 %v2920_v19, %v3060_v4  ;;  %v1523_v57 = vmul.f32 %v2927_v1, %v3060_v4 }
  0xf6   : > { %v1524_v25 = vmul.f32 %v2930_v28, %v3060_v4  ;;  %v1525_v22 = vmul.f32 %v2933_v6, %v3060_v4  ;;  %v1111_v10 = vmul.f32 %v2853_v34, %v2744_v5  ;;  %v1112_v54 = vmul.f32 %v2853_v34, %v2747_v13 }
  0xf7   : > { %v1374_v48 = vrot.slane %v1373_v29, 2  ;;  %v1113_v11 = vmul.f32 %v2853_v34, %v2750_v9  ;;  %v1530_v19 = vadd.f32 %v1522_v52, %v1504_v14  ;;  %v1531_v50 = vadd.f32 %v1523_v57, %v1505_v2 }
  0xf8   : > { %v1532_v59 = vadd.f32 %v1524_v25, %v1506_v51  ;;  %v1533_v1 = vadd.f32 %v1525_v22, %v1507_v37  ;;  %v1128_v28 = vmul.f32 %v2764_v49, %v2859_v39  ;;  %v1129_v6 = vmul.f32 %v2767_v17, %v2859_v39 }
  0xf9   : > { %v1375_v42 = vmax.f32 %v1373_v29, %v1374_v48  ;;  %v1130_v23 = vmul.f32 %v2770_v18, %v2859_v39  ;;  %v1547_v53 = vsel %vm345_vm0, %v1530_v19, -inf  ;;  %v1548_v24 = vsel %vm345_vm0, %v1531_v50, -inf }
  0xfa   : > { %v1549_v34 = vsel %vm345_vm0, %v1532_v59, -inf  ;;  %v1551_v21 = vsel %vm345_vm0, %v1533_v1, -inf  ;;  %v1131_v41 = vmul.f32 %v2776_v43, %v2859_v39  ;;  %v1136_v61 = vadd.f32 %v1128_v28, %v1110_v58 }
  0xfb   : > { %v1376_v38 = vrot.slane %v1375_v42, 1  ;;  %v1550_v33 = vmax.f32 %v1547_v53, %v1549_v34  ;;  %v1552_v47 = vmax.f32 %v1548_v24, %v1551_v21  ;;  %v1137_v62 = vadd.f32 %v1129_v6, %v1111_v10 }
  0xfc   : > { %v1138_v32 = vadd.f32 %v1130_v23, %v1112_v54  ;;  %v1154_v16 = vmul.f32 %v2785_v40, %v2907_v8  ;;  %v1139_v0 = vadd.f32 %v1131_v41, %v1113_v11  ;;  %v1155_v31 = vmul.f32 %v2796_v20, %v2907_v8 }
  0xfd   : > { %v3094_v55 = vmax.f32 %v1375_v42, %v1376_v38  ;;  %v1553_v7 = vmax.f32 %v1550_v33, %v1552_v47  ;;  %v1156_v14 = vmul.f32 %v2801_v12, %v2907_v8  ;;  %v1157_v2 = vmul.f32 %v2804_v27, %v2907_v8 }
  0xfe   : > { %v1162_v39 = vadd.f32 %v1154_v16, %v1136_v61  ;;  %v1180_v29 = vmul.f32 %v2807_v56, %v2936_v46  ;;  %v1163_v37 = vadd.f32 %v1155_v31, %v1137_v62  ;;  %v1181_v58 = vmul.f32 %v2812_v15, %v2936_v46 }
  0xff   : > { %1393 = vrot.lane.b32.xlu1 %v3094_v55, %s2179_s7  ;;  %v1554_v51 = vrot.slane %v1553_v7, 4  ;;  %v1182_v52 = vmul.f32 %v2815_v45, %v2936_v46  ;;  %v1164_v57 = vadd.f32 %v1156_v14, %v1138_v32  ;;  %v1165_v25 = vadd.f32 %v1157_v2, %v1139_v0 }
 0x100   : > { %v1183_v8 = vmul.f32 %v2822_v60, %v2936_v46  ;;  %v1188_v22 = vadd.f32 %v1180_v29, %v1162_v39  ;;  %v1189_v10 = vadd.f32 %v1181_v58, %v1163_v37  ;;  %v1448_v54 = vmul.f32 %v3019_v36, %v2732_v3 }
 0x101   : > { %v1555_v48 = vmax.f32 %v1553_v7, %v1554_v51  ;;  %v1449_v11 = vmul.f32 %v3019_v36, %v2744_v5  ;;  %v1190_v19 = vadd.f32 %v1182_v52, %v1164_v57  ;;  %v1450_v1 = vmul.f32 %v3019_v36, %v2747_v13  ;;  %v3345_v57 = vld [vmem:[#allocation18_spill] sm:$0xff] }
 0x102   : > { %v1191_v50 = vadd.f32 %v1183_v8, %v1165_v25  ;;  %v1196_v59 = vsel %vm345_vm0, %v1188_v22, -inf  ;;  %v1197_v28 = vsel %vm345_vm0, %v1189_v10, -inf  ;;  %v1451_v46 = vmul.f32 %v3019_v36, %v2750_v9 }
 0x103   : > { %v1556_v42 = vrot.slane %v1555_v48, 2  ;;  %v1466_v6 = vmul.f32 %v2764_v49, %v3036_v63  ;;  %v1198_v3 = vsel %vm345_vm0, %v1190_v19, -inf  ;;  %v1467_v23 = vmul.f32 %v2767_v17, %v3036_v63 }
 0x104   : > { %v1200_v5 = vsel %vm345_vm0, %v1191_v50, -inf  ;;  %v1468_v53 = vmul.f32 %v2770_v18, %v3036_v63  ;;  %v1199_v24 = vmax.f32 %v1196_v59, %v1198_v3  ;;  %v1469_v21 = vmul.f32 %v2776_v43, %v3036_v63  ;;  %v375_v63 = vpop.permute.xlu0 %374  ;;  %v3346_v3 = vld [vmem:[#allocation19_spill] sm:$0xff] }
 0x105   : > { %v1557_v13 = vmax.f32 %v1555_v48, %v1556_v42  ;;  %v1201_v34 = vmax.f32 %v1197_v28, %v1200_v5  ;;  %v1474_v9 = vadd.f32 %v1466_v6, %v1448_v54  ;;  %v1475_v36 = vadd.f32 %v1467_v23, %v1449_v11 }
 0x106   : > { %v1476_v38 = vadd.f32 %v1468_v53, %v1450_v1  ;;  %v1492_v49 = vmul.f32 %v2785_v40, %v3047_v26  ;;  %v1477_v41 = vadd.f32 %v1469_v21, %v1451_v46  ;;  %v1493_v17 = vmul.f32 %v2796_v20, %v3047_v26  ;;  %v551_v28 = vpop.permute.xlu1 %550  ;;  %v3347_v53 = vld [vmem:[#allocation11_spill] sm:$0xff] }
 0x107   : > { %v1558_v33 = vrot.slane %v1557_v13, 1  ;;  %v1202_v47 = vmax.f32 %v1199_v24, %v1201_v34  ;;  %v1494_v18 = vmul.f32 %v2801_v12, %v3047_v26  ;;  %v1495_v61 = vmul.f32 %v2804_v27, %v3047_v26  ;;  %v3348_v34 = vld [vmem:[#allocation12_spill] sm:$0xff] }
 0x108   : > { %v1500_v62 = vadd.f32 %v1492_v49, %v1474_v9  ;;  %v1518_v43 = vmul.f32 %v2807_v56, %v3060_v4  ;;  %v1501_v16 = vadd.f32 %v1493_v17, %v1475_v36  ;;  %v1519_v7 = vmul.f32 %v2812_v15, %v3060_v4  ;;  %v377_v37 = vpop.permute.xlu0 %376  ;;  %v3349_v17 = vld [vmem:[#allocation13_spill] sm:$0xff] }
 0x109   : > { %v3142_v32 = vmax.f32 %v1557_v13, %v1558_v33  ;;  %v1203_v40 = vrot.slane %v1202_v47, 4  ;;  %v1502_v0 = vadd.f32 %v1494_v18, %v1476_v38  ;;  %v1503_v20 = vadd.f32 %v1495_v61, %v1477_v41 }
 0x10a   : > { %v1520_v12 = vmul.f32 %v2815_v45, %v3060_v4  ;;  %v1521_v27 = vmul.f32 %v2822_v60, %v3060_v4  ;;  %v1526_v26 = vadd.f32 %v1518_v43, %v1500_v62  ;;  %v1527_v31 = vadd.f32 %v1519_v7, %v1501_v16  ;;  %v3350_v7 = vld [vmem:[#allocation14_spill] sm:$0xff] }
 0x10b   : > { %1564 = vrot.lane.b32.xlu0 %v3142_v32, %s2179_s7  ;;  %v1204_v56 = vmax.f32 %v1202_v47, %v1203_v40  ;;  %v378_v60 = vrot.slane %v2550_v35, 7  ;;  %v1059_v25 = vrot.slane %v3345_v57, 7  ;;  %v1397_v8 = vrot.slane %v3053_v30, 7 }
 0x10c   : > { %v1528_v14 = vadd.f32 %v1520_v12, %v1502_v0  ;;  %v1529_v2 = vadd.f32 %v1521_v27, %v1503_v20  ;;  %v1534_v29 = vsel %vm345_vm0, %v1526_v26, -inf  ;;  %v1535_v15 = vsel %vm345_vm0, %v1527_v31, -inf  ;;  %v3351_v26 = vld [vmem:[#allocation15_spill] sm:$0xff] }
 0x10d   : > { %v1205_v39 = vrot.slane %v1204_v56, 2  ;;  %v389_v22 = vlaneseq  ;;  %v1228_v48 = vrot.slane %v3006_v44, 7  ;;  %v381_v11 = vrot.slane %v377_v37, 7 }
 0x10e   : > { %v1536_v51 = vsel %vm345_vm0, %v1528_v14, -inf  ;;  %v1538_v45 = vsel %vm345_vm0, %v1529_v2, -inf  ;;  %v2180_v19 = vmov 1934713408   ;;  %v3164_v30 = vsel %vm379_vm1, %v1059_v25, %v3346_v3  ;;  %v3353_v25 = vld [vmem:[#allocation17_spill] sm:$0xff] }
 0x10f   : > { %v1206_v4 = vmax.f32 %v1204_v56, %v1205_v39  ;;  %v1537_v58 = vmax.f32 %v1534_v29, %v1536_v51  ;;  %v1539_v52 = vmax.f32 %v1535_v15, %v1538_v45  ;;  %v387_v50 = vunpack.c.l.s4 %v2180_v19  ;;  %v549_v38 = vpop.permute.xlu0 %548 }
 0x110   : > { %v390_v59 = vshrl.u32 %v389_v22, 7  ;;  %v410_v1 = vand.u32 127, %v389_v22  ;;  %v3168_v44 = vsel %vm379_vm1, %v1397_v8, %v3094_v55  ;;  %v382_v23 = vsel %vm379_vm1, %v381_v11, %v375_v63 }
 0x111   : > { %v1207_v10 = vrot.slane %v1206_v4, 1  ;;  %v1540_v54 = vmax.f32 %v1537_v58, %v1539_v52  ;;  %v388_v46 = vunpack.c.0.s8 %v387_v50  ;;  %v380_v13 = vsel %vm379_vm1, %v378_v60, %v3347_v53  ;;  %v3352_v58 = vld [vmem:[#allocation16_spill] sm:$0xff] }
 0x112   : > { %v3160_v6 = vsub.s32 %v410_v1, %v390_v59  ;;  %v552_v21 = vrot.slane %v3348_v34, 7  ;;  %v554_v36 = vrot.slane %v551_v28, 7  ;;  %v385_v49 = vcombine.low %v380_v13, %v382_v23 }
 0x113   : > { %v1208_v42 = vmax.f32 %v1206_v4, %v1207_v10  ;;  %v1541_v35 = vrot.slane %v1540_v54, 4  ;;  %v3178_v33 = vsub.s32 %v388_v46, %v390_v59  ;;  %v1566_v47 = vrot.slane %v3142_v32, 7 }
 0x114   : > { %v553_v18 = vsel %vm379_vm1, %v552_v21, %v3349_v17  ;;  %v555_v61 = vsel %vm379_vm1, %v554_v36, %v549_v38  ;;  %v721_v0 = vrot.slane %v3350_v7, 7  ;;  %v2181_v27 = vmov 0.0  }
 0x115   : > { %1224 = vrot.lane.b32.xlu0 %v1208_v42, %s2179_s7  ;;  %v1542_v5 = vmax.f32 %v1540_v54, %v1541_v35  ;;  %v3175_v24 = vsel %vm379_vm1, %v1228_v48, %v1208_v42  ;;  %v392_v62 = vrot.slane %v385_v49, %v3178_v33  ;;  %v558_v63 = vcombine.low %v553_v18, %v555_v61 }
 0x116   : > { %v722_v31 = vsel %vm379_vm1, %v721_v0, %v3351_v26  ;;  %v890_v52 = vrot.slane %v3352_v58, 7  ;;  %v743_v58 = vstv %s1823_s25 }
 0x117   : > { %v1543_v9 = vrot.slane %v1542_v5, 2  ;;  %v395_v32 = vsel %vm394_vm2, %v392_v62, -inf  ;;  %v565_v12 = vrot.slane %v558_v63, %v3178_v33  ;;  %v393_v56 = vcombine.high %v392_v62, %v2181_v27 }
 0x118   : > { %v891_v8 = vsel %vm379_vm1, %v890_v52, %v3353_v25 }
 0x119   : > { %v1544_v55 = vmax.f32 %v1542_v5, %v1543_v9  ;;  %v398_v39 = vsel %vm394_vm2, %v393_v56, -inf  ;;  %v566_v29 = vcombine.high %v565_v12, %v2181_v27  ;;  %v567_v48 = vsel %vm394_vm2, %v565_v12, -inf }
 0x11b   : > { %v1545_v41 = vrot.slane %v1544_v55, 1  ;;  %v570_v45 = vsel %vm394_vm2, %v566_v29, -inf }
 0x11c   : > { %v720_v40 = vpop.permute.xlu1 %719 }
 0x11d   : > { %v1546_v43 = vmax.f32 %v1544_v55, %v1545_v41  ;;  %v723_v20 = vrot.slane %v720_v40, 7 }
 0x11f   : > { %1562 = vrot.lane.b32.xlu0 %v1546_v43, %s2179_s7  ;;  %v3187_v16 = vsel %vm379_vm1, %v1566_v47, %v1546_v43  ;;  %s401_s7 = sld [smem:[#allocation6]] }
 0x123   : > { %396 = vmax.xlane.f32.xlu1 %v395_v32 }
 0x125   : > { %v718_v14 = vpop.permute.xlu0 %717 }
 0x126   : > { %v724_v2 = vsel %vm379_vm1, %v723_v20, %v718_v14  ;;  %v402_v14 = vstv %s401_s7 }
 0x127   : > { %v727_v15 = vcombine.low %v722_v31, %v724_v2  ;;  %399 = vmax.xlane.f32.xlu1 %v398_v39 }
 0x129   : > { %v734_v51 = vrot.slane %v727_v15, %v3178_v33 }
 0x12b   : > { %571 = vmax.xlane.f32.xlu1 %v570_v45  ;;  %v735_v37 = vcombine.high %v734_v51, %v2181_v27  ;;  %v736_v19 = vsel %vm394_vm2, %v734_v51, -inf  ;;  %v574_v51 = vstv %s1794_s18 }
 0x12d   : > { %v739_v60 = vsel %vm394_vm2, %v735_v37, -inf }
 0x12f   : > { %740 = vmax.xlane.f32.xlu1 %v739_v60 }
 0x131   : > { %v889_v4 = vpop.permute.xlu1 %888 }
 0x132   : > { %v892_v57 = vrot.slane %v889_v4, 7 }
 0x13b   : > { %v887_v22 = vpop.permute.xlu0 %886 }
 0x13c   : > { %v893_v10 = vsel %vm379_vm1, %v892_v57, %v887_v22 }
 0x13d   : > { %v896_v54 = vcombine.low %v891_v8, %v893_v10 }
 0x13e   : > { %568 = vmax.xlane.f32.xlu0 %v567_v48 }
 0x13f   : > { %v903_v11 = vrot.slane %v896_v54, %v3178_v33 }
 0x141   : > { %v904_v50 = vcombine.high %v903_v11, %v2181_v27  ;;  %v905_v59 = vsel %vm394_vm2, %v903_v11, -inf  ;;  %v912_v11 = vstv %s1852_s15 }
 0x142   : > { %906 = vmax.xlane.f32.xlu1 %v905_v59  ;;  %737 = vmax.xlane.f32.xlu0 %v736_v19 }
 0x143   : > { %v908_v1 = vsel %vm394_vm2, %v904_v50, -inf }
 0x146   : > { %909 = vmax.xlane.f32.xlu0 %v908_v1 }
 0x147   : > { %v1058_v42 = vpop.permute.xlu0 %1057 }
 0x148   : > { %v1061_v35 = vrot.slane %v1058_v42, 7 }
 0x151   : > { %v1056_v28 = vpop.permute.xlu1 %1055 }
 0x152   : > { %v1062_v46 = vsel %vm379_vm1, %v1061_v35, %v1056_v28 }
 0x153   : > { %v1065_v3 = vcombine.low %v3164_v30, %v1062_v46 }
 0x155   : > { %v1072_v5 = vrot.slane %v1065_v3, %v3178_v33 }
 0x157   : > { %v1074_v23 = vsel %vm394_vm2, %v1072_v5, -inf  ;;  %v1073_v53 = vcombine.high %v1072_v5, %v2181_v27 }
 0x158   : > { %1075 = vmax.xlane.f32.xlu0 %v1074_v23 }
 0x159   : > { %v1077_v13 = vsel %vm394_vm2, %v1073_v53, -inf }
 0x15a   : > { %1078 = vmax.xlane.f32.xlu1 %v1077_v13 }
 0x15d   : > { %v1227_v34 = vpop.permute.xlu0 %1226 }
 0x15e   : > { %v1230_v55 = vrot.slane %v1227_v34, 7  ;;  %v1081_v34 = vstv %s1881_s21 }
 0x167   : > { %v1396_v21 = vpop.permute.xlu0 %1395 }
 0x168   : > { %v1399_v9 = vrot.slane %v1396_v21, 7 }
 0x171   : > { %v1394_v36 = vpop.permute.xlu1 %1393 }
 0x172   : > { %v1400_v49 = vsel %vm379_vm1, %v1399_v9, %v1394_v36 }
 0x173   : > { %v1403_v30 = vcombine.low %v3168_v44, %v1400_v49 }
 0x175   : > { %v1410_v61 = vrot.slane %v1403_v30, %v3178_v33 }
 0x177   : > { %v1411_v40 = vcombine.high %v1410_v61, %v2181_v27 }
 0x179   : > { %v1415_v20 = vsel %vm394_vm2, %v1411_v40, -inf }
 0x17d   : > { %v1565_v38 = vpop.permute.xlu0 %1564 }
 0x17e   : > { %v1568_v7 = vrot.slane %v1565_v38, 7 }
 0x187   : > { %v1225_v47 = vpop.permute.xlu0 %1224 }
 0x188   : > { %v1231_v41 = vsel %vm379_vm1, %v1230_v55, %v1225_v47 }
 0x189   : > { %v1234_v17 = vcombine.low %v3175_v24, %v1231_v41  ;;  %v1412_v24 = vsel %vm394_vm2, %v1410_v61, -inf  ;;  %v1250_v41 = vstv %s1910_s30 }
 0x18b   : > { %v1241_v18 = vrot.slane %v1234_v17, %v3178_v33 }
 0x18d   : > { %v1243_v62 = vsel %vm394_vm2, %v1241_v18, -inf  ;;  %v1242_v43 = vcombine.high %v1241_v18, %v2181_v27 }
 0x18e   : > { %1244 = vmax.xlane.f32.xlu0 %v1243_v62  ;;  %v1419_v62 = vstv %s1939_s20 }
 0x18f   : > { %v1246_v63 = vsel %vm394_vm2, %v1242_v43, -inf }
 0x190   : > { %1247 = vmax.xlane.f32.xlu1 %v1246_v63 }
 0x191   : > { %v1563_v44 = vpop.permute.xlu0 %1562 }
 0x192   : > { %v1569_v0 = vsel %vm379_vm1, %v1568_v7, %v1563_v44  ;;  %1413 = vmax.xlane.f32.xlu0 %v1412_v24 }
 0x193   : > { %v1572_v32 = vcombine.low %v3187_v16, %v1569_v0 }
 0x194   : > { %1416 = vmax.xlane.f32.xlu1 %v1415_v20 }
 0x195   : > { %v1579_v12 = vrot.slane %v1572_v32, %v3178_v33 }
 0x197   : > { %v1581_v56 = vsel %vm394_vm2, %v1579_v12, -inf  ;;  %v1580_v26 = vcombine.high %v1579_v12, %v2181_v27 }
 0x198   : > { %1582 = vmax.xlane.f32.xlu0 %v1581_v56  ;;  %v1588_v56 = vstv %s1968_s22 }
 0x199   : > { %v1584_v31 = vsel %vm394_vm2, %v1580_v26, -inf }
 0x19a   : > { %1585 = vmax.xlane.f32.xlu1 %v1584_v31 }
 0x1b0   : > { %v397_v2 = vpop.xlane.xlu1 %396 }
 0x1b1   : > { %v403_v16 = vadd.f32 %v402_v14, %v397_v2 }
 0x1b3   : > { %v405_v39 = vmax.f32 %v403_v16, 0.0 }
 0x1b4   : > { %v400_v33 = vpop.xlane.xlu1 %399 }
 0x1b5   : > { %v414_v27 = vrot.slane %v405_v39, %v3160_v6  ;;  %v404_v29 = vadd.f32 %v402_v14, %v400_v33 }
 0x1b7   : > { %422 = vst.msk [vmem:[%s3241_s4] sm:$0x1] %vm421_vm3, %v414_v27  ;;  %v406_v15 = vmax.f32 %v404_v29, 0.0 }
 0x1b8   : > { %v572_v45 = vpop.xlane.xlu1 %571 }
 0x1b9   : > { %v418_v37 = vrot.slane %v406_v15, %v3160_v6  ;;  %v576_v60 = vadd.f32 %v574_v51, %v572_v45 }
 0x1bb   : > { %423 = vst.msk [vmem:[%s3241_s4 + $0x8] sm:$0x1] %vm421_vm3, %v418_v37  ;;  %v578_v4 = vmax.f32 %v576_v60, 0.0 }
 0x1bc   : > { %v741_v52 = vpop.xlane.xlu1 %740 }
 0x1bd   : > { %v588_v57 = vrot.slane %v578_v4, %v3160_v6  ;;  %v745_v25 = vadd.f32 %v743_v58, %v741_v52 }
 0x1bf   : > { %592 = vst.msk [vmem:[%s3241_s4 + $0x9] sm:$0x1] %vm421_vm3, %v588_v57  ;;  %v747_v8 = vmax.f32 %v745_v25, 0.0 }
 0x1c1   : > { %v757_v22 = vrot.slane %v747_v8, %v3160_v6 }
 0x1c3   : > { %761 = vst.msk [vmem:[%s3241_s4 + $0xa] sm:$0x1] %vm421_vm3, %v757_v22 }
 0x1cb   : > { %v569_v48 = vpop.xlane.xlu0 %568 }
 0x1cc   : > { %v575_v10 = vadd.f32 %v574_v51, %v569_v48 }
 0x1ce   : > { %v577_v54 = vmax.f32 %v575_v10, 0.0 }
 0x1cf   : > { %v907_v19 = vpop.xlane.xlu1 %906  ;;  %v738_v50 = vpop.xlane.xlu0 %737 }
 0x1d0   : > { %v913_v59 = vadd.f32 %v912_v11, %v907_v19  ;;  %v584_v1 = vrot.slane %v577_v54, %v3160_v6  ;;  %v744_v42 = vadd.f32 %v743_v58, %v738_v50 }
 0x1d2   : > { %v915_v35 = vmax.f32 %v913_v59, 0.0  ;;  %591 = vst.msk [vmem:[%s3241_s4 + $0x1] sm:$0x1] %vm421_vm3, %v584_v1  ;;  %v746_v28 = vmax.f32 %v744_v42, 0.0 }
 0x1d3   : > { %v910_v46 = vpop.xlane.xlu0 %909 }
 0x1d4   : > { %v922_v3 = vrot.slane %v915_v35, %v3160_v6  ;;  %v753_v5 = vrot.slane %v746_v28, %v3160_v6  ;;  %v914_v23 = vadd.f32 %v912_v11, %v910_v46 }
 0x1d6   : > { %929 = vst.msk [vmem:[%s3241_s4 + $0x3] sm:$0x1] %vm421_vm3, %v922_v3  ;;  %760 = vst.msk [vmem:[%s3241_s4 + $0x2] sm:$0x1] %vm421_vm3, %v753_v5  ;;  %v916_v53 = vmax.f32 %v914_v23, 0.0 }
 0x1d8   : > { %v926_v13 = vrot.slane %v916_v53, %v3160_v6 }
 0x1da   : > { %930 = vst.msk [vmem:[%s3241_s4 + $0xb] sm:$0x1] %vm421_vm3, %v926_v13 }
 0x1e5   : > { %v1076_v21 = vpop.xlane.xlu0 %1075 }
 0x1e6   : > { %v1082_v9 = vadd.f32 %v1081_v34, %v1076_v21 }
 0x1e7   : > { %v1079_v36 = vpop.xlane.xlu1 %1078 }
 0x1e8   : > { %v1084_v38 = vmax.f32 %v1082_v9, 0.0  ;;  %v1083_v49 = vadd.f32 %v1081_v34, %v1079_v36 }
 0x1ea   : > { %v1091_v55 = vrot.slane %v1084_v38, %v3160_v6  ;;  %v1085_v30 = vmax.f32 %v1083_v49, 0.0 }
 0x1ec   : > { %1098 = vst.msk [vmem:[%s3241_s4 + $0x4] sm:$0x1] %vm421_vm3, %v1091_v55  ;;  %v1095_v47 = vrot.slane %v1085_v30, %v3160_v6 }
 0x1ee   : > { %1099 = vst.msk [vmem:[%s3241_s4 + $0xc] sm:$0x1] %vm421_vm3, %v1095_v47 }
 0x21b   : > { %v1245_v17 = vpop.xlane.xlu0 %1244 }
 0x21c   : > { %v1251_v18 = vadd.f32 %v1250_v41, %v1245_v17 }
 0x21d   : > { %v1248_v61 = vpop.xlane.xlu1 %1247 }
 0x21e   : > { %v1253_v43 = vmax.f32 %v1251_v18, 0.0  ;;  %v1252_v63 = vadd.f32 %v1250_v41, %v1248_v61 }
 0x21f   : > { %v1414_v40 = vpop.xlane.xlu0 %1413 }
 0x220   : > { %v1260_v7 = vrot.slane %v1253_v43, %v3160_v6  ;;  %v1254_v44 = vmax.f32 %v1252_v63, 0.0  ;;  %v1420_v24 = vadd.f32 %v1419_v62, %v1414_v40 }
 0x221   : > { %v1417_v0 = vpop.xlane.xlu1 %1416 }
 0x222   : > { %1267 = vst.msk [vmem:[%s3241_s4 + $0x5] sm:$0x1] %vm421_vm3, %v1260_v7  ;;  %v1264_v32 = vrot.slane %v1254_v44, %v3160_v6  ;;  %v1422_v20 = vmax.f32 %v1420_v24, 0.0  ;;  %v1421_v12 = vadd.f32 %v1419_v62, %v1417_v0 }
 0x224   : > { %1268 = vst.msk [vmem:[%s3241_s4 + $0xd] sm:$0x1] %vm421_vm3, %v1264_v32  ;;  %v1429_v26 = vrot.slane %v1422_v20, %v3160_v6  ;;  %v1423_v31 = vmax.f32 %v1421_v12, 0.0 }
 0x225   : > { %v1583_v14 = vpop.xlane.xlu0 %1582 }
 0x226   : > { %1436 = vst.msk [vmem:[%s3241_s4 + $0x6] sm:$0x1] %vm421_vm3, %v1429_v26  ;;  %v1433_v2 = vrot.slane %v1423_v31, %v3160_v6  ;;  %v1589_v16 = vadd.f32 %v1588_v56, %v1583_v14 }
 0x227   : > { %v1586_v39 = vpop.xlane.xlu1 %1585 }
 0x228   : > { %1437 = vst.msk [vmem:[%s3241_s4 + $0xe] sm:$0x1] %vm421_vm3, %v1433_v2  ;;  %v1591_v33 = vmax.f32 %v1589_v16, 0.0  ;;  %v1590_v27 = vadd.f32 %v1588_v56, %v1586_v39 }
 0x22a   : > { %v1598_v29 = vrot.slane %v1591_v33, %v3160_v6  ;;  %v1592_v15 = vmax.f32 %v1590_v27, 0.0 }
 0x22c   : > { %1605 = vst.msk [vmem:[%s3241_s4 + $0x7] sm:$0x1] %vm421_vm3, %v1598_v29  ;;  %v1602_v51 = vrot.slane %v1592_v15, %v3160_v6 }
 0x22e   : > { %1606 = vst.msk [vmem:[%s3241_s4 + $0xf] sm:$0x1] %vm421_vm3, %v1602_v51 }
 0x22f PF: > { %s18_s17 = sadd.s32 1, %s2172_s17   ;;  %s3354_s12 = smov %s2156_s13 }
 0x230   : > { %p15_p9 = scmp.ge.s32.totalorder %s18_s17, 4   ;;  %s3355_s13 = smov %s2160_s14 }
 0x231   : > { %s3356_s14 = smov %s2294_s27  ;;  %s3357_s15 = smov %s2168_s16 }
 0x232   : > { %s3358_s16 = smov %s3360_s9  ;;  %17 = sbr.rel (!%p15_p9) target bundleno = 6 (0x6), region = 84 }
 0x239   :  { %1637 = vsyncpa [#allocation3], 1 }
 0x23a   :  { %1639 = vsyncpa [#allocation3 + $0x1], 1 }
 0x23b   :  { %1640 = vsyncpa [#allocation4], 1 }
 0x23c   :  { %1642 = vsyncpa [#allocation4 + $0x1], 1 }
 0x23d   :  { %1643 = vsyncpa [#allocation7], 1 }

</bundles_post_ra>
